<compile_context>
chip_gen: v7x
topology: tpu7x:2x2x1
jax: 0.10.0
libtpu: 0.0.40
codegen_flags: <defaults>
</compile_context>

<pallas_src>
import functools
import math

import jax
import jax.numpy as jnp
from jax.experimental import pallas as pl
from jax.experimental.pallas import tpu as pltpu


_VMEM_LIMIT = 48 * 1024 * 1024  # within physical VMEM on v5e/v6e (128 MiB) and v7x (64 MiB)


def _pick_tile(dim, target, align=128):
    """Largest divisor of `dim` that is <= target, preferring `align`-multiples."""
    if dim <= target:
        return dim
    best = None
    for t in range(target, 0, -1):
        if dim % t == 0:
            if t % align == 0:
                return t
            if best is None:
                best = t
    return best if best is not None else dim


# ------------------------- tiled dense (bias + optional activation) -------------------------

def _dense_kernel(x_ref, w_ref, b_ref, o_ref, acc_ref, *, act):
    @pl.when(pl.program_id(2) == 0)
    def _init():
        acc_ref[...] = jnp.zeros_like(acc_ref)

    acc_ref[...] += jnp.dot(x_ref[...], w_ref[...],
                            preferred_element_type=jnp.float32)

    @pl.when(pl.program_id(2) == pl.num_programs(2) - 1)
    def _finish():
        y = acc_ref[...] + b_ref[...]
        if act == "gelu":
            # TODO(synk): HF BERT default is exact erf-GELU; tanh approximation used here.
            c = math.sqrt(2.0 / math.pi)
            y = 0.5 * y * (1.0 + jnp.tanh(c * (y + 0.044715 * y * y * y)))
        elif act == "tanh":
            y = jnp.tanh(y)
        o_ref[...] = y.astype(o_ref.dtype)


def dense(x, w, b, act="none", out_dtype=jnp.bfloat16, tm=256, tn=512, tk=512):
    M, K = x.shape
    _, N = w.shape
    tm = _pick_tile(M, tm)
    tn = _pick_tile(N, tn)
    tk = _pick_tile(K, tk)
    b2 = b.reshape(1, N).astype(jnp.float32)
    return pl.pallas_call(
        functools.partial(_dense_kernel, act=act),
        out_shape=jax.ShapeDtypeStruct((M, N), out_dtype),
        grid=(M // tm, N // tn, K // tk),
        in_specs=[
            pl.BlockSpec((tm, tk), lambda i, j, k: (i, k)),
            pl.BlockSpec((tk, tn), lambda i, j, k: (k, j)),
            pl.BlockSpec((1, tn), lambda i, j, k: (0, j)),
        ],
        out_specs=pl.BlockSpec((tm, tn), lambda i, j, k: (i, j)),
        scratch_shapes=[pltpu.VMEM((tm, tn), jnp.float32)],
        compiler_params=pltpu.CompilerParams(
            dimension_semantics=("parallel", "parallel", "arbitrary"),
            vmem_limit_bytes=_VMEM_LIMIT),
    )(x.astype(jnp.bfloat16), w.astype(jnp.bfloat16), b2)


# ------------------- tiled dense fused with bias + residual + LayerNorm -------------------

def _dense_add_ln_kernel(x_ref, w_ref, b_ref, r_ref, g_ref, be_ref,
                         o_ref, acc_ref, *, eps):
    @pl.when(pl.program_id(1) == 0)
    def _init():
        acc_ref[...] = jnp.zeros_like(acc_ref)

    acc_ref[...] += jnp.dot(x_ref[...], w_ref[...],
                            preferred_element_type=jnp.float32)

    @pl.when(pl.program_id(1) == pl.num_programs(1) - 1)
    def _finish():
        y = acc_ref[...] + b_ref[...] + r_ref[...].astype(jnp.float32)
        mu = jnp.mean(y, axis=-1, keepdims=True)
        yc = y - mu
        var = jnp.mean(yc * yc, axis=-1, keepdims=True)
        inv = jax.lax.rsqrt(var + eps)
        o_ref[...] = (yc * inv * g_ref[...] + be_ref[...]).astype(o_ref.dtype)


def dense_add_layernorm(x, w, b, residual, gamma, beta, eps=1e-12,
                        out_dtype=jnp.bfloat16, tm=256, tk=512):
    """LayerNorm((x @ w + b) + residual); N (= hidden) stays untiled for the LN epilogue."""
    M, K = x.shape
    _, N = w.shape
    tm = _pick_tile(M, tm)
    tk = _pick_tile(K, tk)
    b2 = b.reshape(1, N).astype(jnp.float32)
    g2 = gamma.reshape(1, N).astype(jnp.float32)
    be2 = beta.reshape(1, N).astype(jnp.float32)
    return pl.pallas_call(
        functools.partial(_dense_add_ln_kernel, eps=eps),
        out_shape=jax.ShapeDtypeStruct((M, N), out_dtype),
        grid=(M // tm, K // tk),
        in_specs=[
            pl.BlockSpec((tm, tk), lambda i, k: (i, k)),
            pl.BlockSpec((tk, N), lambda i, k: (k, 0)),
            pl.BlockSpec((1, N), lambda i, k: (0, 0)),
            pl.BlockSpec((tm, N), lambda i, k: (i, 0)),
            pl.BlockSpec((1, N), lambda i, k: (0, 0)),
            pl.BlockSpec((1, N), lambda i, k: (0, 0)),
        ],
        out_specs=pl.BlockSpec((tm, N), lambda i, k: (i, 0)),
        scratch_shapes=[pltpu.VMEM((tm, N), jnp.float32)],
        compiler_params=pltpu.CompilerParams(
            dimension_semantics=("parallel", "arbitrary"),
            vmem_limit_bytes=_VMEM_LIMIT),
    )(x.astype(jnp.bfloat16), w.astype(jnp.bfloat16), b2,
      residual.astype(jnp.bfloat16), g2, be2)


# ------------------------- plain LayerNorm (embeddings, no residual) -------------------------

def _ln_kernel(x_ref, g_ref, b_ref, o_ref, *, eps):
    x = x_ref[...].astype(jnp.float32)
    mu = jnp.mean(x, axis=-1, keepdims=True)
    xc = x - mu
    var = jnp.mean(xc * xc, axis=-1, keepdims=True)
    inv = jax.lax.rsqrt(var + eps)
    o_ref[...] = (xc * inv * g_ref[...] + b_ref[...]).astype(o_ref.dtype)


def layernorm(x, gamma, beta, eps=1e-12, out_dtype=jnp.bfloat16, tm=256):
    M, H = x.shape
    tm = _pick_tile(M, tm, align=8)
    g2 = gamma.reshape(1, H).astype(jnp.float32)
    b2 = beta.reshape(1, H).astype(jnp.float32)
    return pl.pallas_call(
        functools.partial(_ln_kernel, eps=eps),
        out_shape=jax.ShapeDtypeStruct((M, H), out_dtype),
        grid=(M // tm,),
        in_specs=[
            pl.BlockSpec((tm, H), lambda i: (i, 0)),
            pl.BlockSpec((1, H), lambda i: (0, 0)),
            pl.BlockSpec((1, H), lambda i: (0, 0)),
        ],
        out_specs=pl.BlockSpec((tm, H), lambda i: (i, 0)),
        compiler_params=pltpu.CompilerParams(
            dimension_semantics=("parallel",),
            vmem_limit_bytes=_VMEM_LIMIT),
    )(x, g2, b2)


# ------------------------- multi-head attention -------------------------

def _mha_kernel(q_ref, k_ref, v_ref, m_ref, o_ref, *, num_heads, head_dim):
    q = q_ref[0]      # [S, H] bf16
    k = k_ref[0]
    v = v_ref[0]
    mask = m_ref[0]   # [1, S] f32 additive mask
    scale = 1.0 / math.sqrt(head_dim)
    dims = (((1,), (1,)), ((), ()))   # q @ k^T without explicit transpose
    ctxs = []
    for h in range(num_heads):        # static unroll over heads
        sl = slice(h * head_dim, (h + 1) * head_dim)
        qh, kh, vh = q[:, sl], k[:, sl], v[:, sl]
        s = jax.lax.dot_general(qh, kh, dims,
                                preferred_element_type=jnp.float32) * scale
        s = s + mask                                  # mask key positions
        s = s - jnp.max(s, axis=-1, keepdims=True)
        p = jnp.exp(s)
        p = p * pl.reciprocal(jnp.sum(p, axis=-1, keepdims=True), approx=True)
        ctxs.append(jnp.dot(p.astype(v.dtype), vh,
                            preferred_element_type=jnp.float32))
    # Single lane-dense store of the full-H context (no narrow masked stores).
    o_ref[0] = jnp.concatenate(ctxs, axis=-1).astype(o_ref.dtype)


def mha(q, k, v, mask_add, num_heads, head_dim):
    B, S, H = q.shape
    m3 = mask_add.reshape(B, 1, S).astype(jnp.float32)
    # TODO(synk): for long sequences switch to online-softmax (flash-style) with a
    # K/V-tile grid axis instead of materializing the [S, S] scores per head.
    return pl.pallas_call(
        functools.partial(_mha_kernel, num_heads=num_heads, head_dim=head_dim),
        out_shape=jax.ShapeDtypeStruct((B, S, H), jnp.bfloat16),
        grid=(B,),
        in_specs=[
            pl.BlockSpec((1, S, H), lambda b: (b, 0, 0)),
            pl.BlockSpec((1, S, H), lambda b: (b, 0, 0)),
            pl.BlockSpec((1, S, H), lambda b: (b, 0, 0)),
            pl.BlockSpec((1, 1, S), lambda b: (b, 0, 0)),
        ],
        out_specs=pl.BlockSpec((1, S, H), lambda b: (b, 0, 0)),
        compiler_params=pltpu.CompilerParams(
            dimension_semantics=("parallel",),
            vmem_limit_bytes=_VMEM_LIMIT),
    )(q.astype(jnp.bfloat16), k.astype(jnp.bfloat16),
      v.astype(jnp.bfloat16), m3)


# ------------------------- BERT forward (glue) -------------------------

def init_params(key, *, vocab, hidden, layers, intermediate, max_pos, type_vocab=2):
    def nrm(k, shape):
        return jax.random.normal(k, shape, dtype=jnp.float32) * 0.02

    keys = jax.random.split(key, 4 + layers)
    params = {
        "word_emb": nrm(keys[0], (vocab, hidden)),
        "pos_emb": nrm(keys[1], (max_pos, hidden)),
        "type_emb": nrm(keys[2], (type_vocab, hidden)),
        "emb_ln_g": jnp.ones((hidden,), jnp.float32),
        "emb_ln_b": jnp.zeros((hidden,), jnp.float32),
        "wp": nrm(keys[3], (hidden, hidden)),
        "bp": jnp.zeros((hidden,), jnp.float32),
        "layers": [],
    }
    for li in range(layers):
        lk = jax.random.split(keys[4 + li], 6)
        params["layers"].append({
            "wq": nrm(lk[0], (hidden, hidden)), "bq": jnp.zeros((hidden,), jnp.float32),
            "wk": nrm(lk[1], (hidden, hidden)), "bk": jnp.zeros((hidden,), jnp.float32),
            "wv": nrm(lk[2], (hidden, hidden)), "bv": jnp.zeros((hidden,), jnp.float32),
            "wo": nrm(lk[3], (hidden, hidden)), "bo": jnp.zeros((hidden,), jnp.float32),
            "ln1_g": jnp.ones((hidden,), jnp.float32), "ln1_b": jnp.zeros((hidden,), jnp.float32),
            "w1": nrm(lk[4], (hidden, intermediate)), "b1": jnp.zeros((intermediate,), jnp.float32),
            "w2": nrm(lk[5], (intermediate, hidden)), "b2": jnp.zeros((hidden,), jnp.float32),
            "ln2_g": jnp.ones((hidden,), jnp.float32), "ln2_b": jnp.zeros((hidden,), jnp.float32),
        })
    return params


def bert_pooled_output(params, input_ids, attention_mask, *, num_heads):
    """Reproduces BertModel(...).pooler_output (eval mode, dropout = identity)."""
    B, S = input_ids.shape
    H = params["word_emb"].shape[1]
    head_dim = H // num_heads

    # Embeddings: gather + adds are glue; LayerNorm is a Pallas kernel (no zero residual).
    emb = (params["word_emb"][input_ids]
           + params["pos_emb"][:S][None, :, :]
           + params["type_emb"][0][None, None, :])
    xf = layernorm(emb.reshape(B * S, H), params["emb_ln_g"], params["emb_ln_b"])

    # Additive attention mask: 0 where attended, -10000 where masked (original BERT).
    mask_add = (1.0 - attention_mask.astype(jnp.float32)) * -10000.0  # [B, S]

    for layer in params["layers"]:
        # Fused QKV projection: one [H, 3H] matmul.
        w_qkv = jnp.concatenate([layer["wq"], layer["wk"], layer["wv"]], axis=1)
        b_qkv = jnp.concatenate([layer["bq"], layer["bk"], layer["bv"]], axis=0)
        qkv = dense(xf, w_qkv, b_qkv)                              # [B*S, 3H] bf16
        q = qkv[:, :H].reshape(B, S, H)
        k = qkv[:, H:2 * H].reshape(B, S, H)
        v = qkv[:, 2 * H:].reshape(B, S, H)

        ctx = mha(q, k, v, mask_add, num_heads, head_dim)          # [B, S, H] bf16

        # Output projection fused with bias + residual + LayerNorm.
        xf = dense_add_layernorm(ctx.reshape(B * S, H), layer["wo"], layer["bo"],
                                 xf, layer["ln1_g"], layer["ln1_b"])
        # FFN: dense + GELU, then dense fused with residual + LayerNorm.
        ff = dense(xf, layer["w1"], layer["b1"], act="gelu")
        xf = dense_add_layernorm(ff, layer["w2"], layer["b2"],
                                 xf, layer["ln2_g"], layer["ln2_b"])

    x = xf.reshape(B, S, H)
    cls = x[:, 0, :]                                                # [B, H]
    pooled = dense(cls, params["wp"], params["bp"], act="tanh",
                   out_dtype=jnp.float32)                           # [B, H] f32
    return pooled


# ------------------------- main -------------------------

if __name__ == "__main__":
    # Small BERT config consistent with the forward pass.
    VOCAB, HIDDEN, LAYERS, HEADS, INTER, MAX_POS = 100, 32, 2, 4, 64, 16
    B, S = 2, 8

    key = jax.random.PRNGKey(0)
    pkey, ikey = jax.random.split(key)
    params = init_params(pkey, vocab=VOCAB, hidden=HIDDEN, layers=LAYERS,
                         intermediate=INTER, max_pos=MAX_POS)

    input_ids = jax.random.randint(ikey, (B, S), 0, VOCAB, dtype=jnp.int32)
    attention_mask = jnp.ones((B, S), dtype=jnp.int32)
    attention_mask = attention_mask.at[1, 6:].set(0)  # exercise masking

    forward = jax.jit(functools.partial(bert_pooled_output, num_heads=HEADS))
    pooled = forward(params, input_ids, attention_mask)
    pooled = jax.block_until_ready(pooled)

    assert pooled.shape == (B, HIDDEN) and pooled.dtype == jnp.float32
    assert bool(jnp.all(jnp.isfinite(pooled)))
    print("KERNEL_OK")
</pallas_src>

<mosaic_0001>
module attributes {stable_mosaic.version = 11 : i64} {
  func.func @_ln_kernel(%arg0: i32, %arg1: memref<16x32xf32, #tpu.memory_space<vmem>>, %arg2: memref<1x32xf32, #tpu.memory_space<vmem>>, %arg3: memref<1x32xf32, #tpu.memory_space<vmem>>, %arg4: memref<16x32xbf16, #tpu.memory_space<vmem>>) attributes {dimension_semantics = [#tpu.dimension_semantics<parallel>], iteration_bounds = array<i64: 1>, scalar_prefetch = 0 : i64, scratch_operands = 0 : i64, tpu.core_type = #tpu.core_type<tc>, window_params = [{transform_indices = @transform_0, window_bounds = array<i64: 16, 32>}, {pipeline_mode = #tpu.pipeline_mode<synchronous>, transform_indices = @transform_1, window_bounds = array<i64: 1, 32>}, {pipeline_mode = #tpu.pipeline_mode<synchronous>, transform_indices = @transform_2, window_bounds = array<i64: 1, 32>}, {transform_indices = @transform_3, window_bounds = array<i64: 16, 32>}]} {
    %c0 = arith.constant 0 : index
    %c0_0 = arith.constant 0 : index
    %0 = vector.load %arg1[%c0, %c0_0] : memref<16x32xf32, #tpu.memory_space<vmem>>, vector<16x32xf32>
    %cst = arith.constant dense<0.000000e+00> : vector<16xf32>
    %1 = vector.multi_reduction <add>, %0, %cst [1] : vector<16x32xf32> to vector<16xf32>
    %2 = vector.shape_cast %1 : vector<16xf32> to vector<16x1xf32>
    %cst_1 = arith.constant 3.200000e+01 : f32
    %3 = vector.broadcast %cst_1 : f32 to vector<16x1xf32>
    %4 = arith.divf %2, %3 : vector<16x1xf32>
    %5 = vector.broadcast %4 : vector<16x1xf32> to vector<16x32xf32>
    %6 = arith.subf %0, %5 : vector<16x32xf32>
    %7 = arith.mulf %6, %6 : vector<16x32xf32>
    %cst_2 = arith.constant dense<0.000000e+00> : vector<16xf32>
    %8 = vector.multi_reduction <add>, %7, %cst_2 [1] : vector<16x32xf32> to vector<16xf32>
    %9 = vector.shape_cast %8 : vector<16xf32> to vector<16x1xf32>
    %cst_3 = arith.constant 3.200000e+01 : f32
    %10 = vector.broadcast %cst_3 : f32 to vector<16x1xf32>
    %11 = arith.divf %9, %10 : vector<16x1xf32>
    %cst_4 = arith.constant 9.99999996E-13 : f32
    %12 = vector.broadcast %cst_4 : f32 to vector<16x1xf32>
    %13 = arith.addf %11, %12 : vector<16x1xf32>
    %14 = math.rsqrt %13 : vector<16x1xf32>
    %15 = vector.broadcast %14 : vector<16x1xf32> to vector<16x32xf32>
    %16 = arith.mulf %6, %15 : vector<16x32xf32>
    %c0_5 = arith.constant 0 : index
    %c0_6 = arith.constant 0 : index
    %17 = vector.load %arg2[%c0_5, %c0_6] : memref<1x32xf32, #tpu.memory_space<vmem>>, vector<1x32xf32>
    %18 = vector.broadcast %17 : vector<1x32xf32> to vector<16x32xf32>
    %19 = arith.mulf %16, %18 : vector<16x32xf32>
    %c0_7 = arith.constant 0 : index
    %c0_8 = arith.constant 0 : index
    %20 = vector.load %arg3[%c0_7, %c0_8] : memref<1x32xf32, #tpu.memory_space<vmem>>, vector<1x32xf32>
    %21 = vector.broadcast %20 : vector<1x32xf32> to vector<16x32xf32>
    %22 = arith.addf %19, %21 : vector<16x32xf32>
    %23 = arith.truncf %22 : vector<16x32xf32> to vector<16x32xbf16>
    %c0_9 = arith.constant 0 : index
    %c0_10 = arith.constant 0 : index
    %24 = vector.load %arg4[%c0_9, %c0_10] : memref<16x32xbf16, #tpu.memory_space<vmem>>, vector<16x32xbf16>
    tpu.vector_store %arg4[%c0_9, %c0_10], %23 {strides = array<i32>} : memref<16x32xbf16, #tpu.memory_space<vmem>>, vector<16x32xbf16>,
    return
  }
  func.func @transform_0(%arg0: i32) -> (i32, i32) {
    %c0_i32 = arith.constant 0 : i32
    %c0_i32_0 = arith.constant 0 : i32
    return %arg0, %c0_i32 : i32, i32
  }
  func.func @transform_1(%arg0: i32) -> (i32, i32) {
    %c0_i32 = arith.constant 0 : i32
    %c0_i32_0 = arith.constant 0 : i32
    %c0_i32_1 = arith.constant 0 : i32
    return %c0_i32, %c0_i32_0 : i32, i32
  }
  func.func @transform_2(%arg0: i32) -> (i32, i32) {
    %c0_i32 = arith.constant 0 : i32
    %c0_i32_0 = arith.constant 0 : i32
    %c0_i32_1 = arith.constant 0 : i32
    return %c0_i32, %c0_i32_0 : i32, i32
  }
  func.func @transform_3(%arg0: i32) -> (i32, i32) {
    %c0_i32 = arith.constant 0 : i32
    %c0_i32_0 = arith.constant 0 : i32
    return %arg0, %c0_i32 : i32, i32
  }
}

module attributes {stable_mosaic.version = 11 : i64} {
  func.func @_dense_kernel(%arg0: i32, %arg1: i32, %arg2: i32, %arg3: memref<16x32xbf16, #tpu.memory_space<vmem>>, %arg4: memref<32x96xbf16, #tpu.memory_space<vmem>>, %arg5: memref<1x96xf32, #tpu.memory_space<vmem>>, %arg6: memref<16x96xbf16, #tpu.memory_space<vmem>>, %arg7: memref<16x96xf32, #tpu.memory_space<vmem>>) attributes {dimension_semantics = [#tpu.dimension_semantics<parallel>, #tpu.dimension_semantics<parallel>, #tpu.dimension_semantics<arbitrary>], iteration_bounds = array<i64: 1, 1, 1>, scalar_prefetch = 0 : i64, scratch_operands = 1 : i64, tpu.core_type = #tpu.core_type<tc>, window_params = [{transform_indices = @transform_0, window_bounds = array<i64: 16, 32>}, {transform_indices = @transform_1, window_bounds = array<i64: 32, 96>}, {transform_indices = @transform_2, window_bounds = array<i64: 1, 96>}, {transform_indices = @transform_3, window_bounds = array<i64: 16, 96>}]} {
    %c0_i32 = arith.constant 0 : i32
    %0 = arith.cmpi eq, %arg2, %c0_i32 : i32
    %1 = arith.extui %0 : i1 to i32
    %c0_i32_0 = arith.constant 0 : i32
    %2 = arith.cmpi ne, %1, %c0_i32_0 : i32
    scf.if %2 {
      %cst_10 = arith.constant 0.000000e+00 : f32
      %12 = vector.broadcast %cst_10 : f32 to vector<16x96xf32>
      %c0_11 = arith.constant 0 : index
      %c0_12 = arith.constant 0 : index
      %13 = vector.load %arg7[%c0_11, %c0_12] : memref<16x96xf32, #tpu.memory_space<vmem>>, vector<16x96xf32>
      tpu.vector_store %arg7[%c0_11, %c0_12], %12 {strides = array<i32>} : memref<16x96xf32, #tpu.memory_space<vmem>>, vector<16x96xf32>,
    } else {
    }
    %c0 = arith.constant 0 : index
    %c0_1 = arith.constant 0 : index
    %3 = vector.load %arg7[%c0, %c0_1] : memref<16x96xf32, #tpu.memory_space<vmem>>, vector<16x96xf32>
    %c0_2 = arith.constant 0 : index
    %c0_3 = arith.constant 0 : index
    %4 = vector.load %arg3[%c0_2, %c0_3] : memref<16x32xbf16, #tpu.memory_space<vmem>>, vector<16x32xbf16>
    %c0_4 = arith.constant 0 : index
    %c0_5 = arith.constant 0 : index
    %5 = vector.load %arg4[%c0_4, %c0_5] : memref<32x96xbf16, #tpu.memory_space<vmem>>, vector<32x96xbf16>
    %cst = arith.constant dense<0.000000e+00> : vector<16x96xf32>
    %6 = tpu.matmul %4, %5, %cst {dimension_numbers = #tpu.dot_dimension_numbers<[1], [0], [0], [1], [0, 0, 1, 1], [], []>} : vector<16x32xbf16>, vector<32x96xbf16>, vector<16x96xf32> -> vector<16x96xf32>
    %7 = arith.addf %3, %6 : vector<16x96xf32>
    %c0_6 = arith.constant 0 : index
    %c0_7 = arith.constant 0 : index
    %8 = vector.load %arg7[%c0_6, %c0_7] : memref<16x96xf32, #tpu.memory_space<vmem>>, vector<16x96xf32>
    tpu.vector_store %arg7[%c0_6, %c0_7], %7 {strides = array<i32>} : memref<16x96xf32, #tpu.memory_space<vmem>>, vector<16x96xf32>,
    %c0_i32_8 = arith.constant 0 : i32
    %9 = arith.cmpi eq, %arg2, %c0_i32_8 : i32
    %10 = arith.extui %9 : i1 to i32
    %c0_i32_9 = arith.constant 0 : i32
    %11 = arith.cmpi ne, %10, %c0_i32_9 : i32
    scf.if %11 {
      %c0_10 = arith.constant 0 : index
      %c0_11 = arith.constant 0 : index
      %12 = vector.load %arg7[%c0_10, %c0_11] : memref<16x96xf32, #tpu.memory_space<vmem>>, vector<16x96xf32>
      %c0_12 = arith.constant 0 : index
      %c0_13 = arith.constant 0 : index
      %13 = vector.load %arg5[%c0_12, %c0_13] : memref<1x96xf32, #tpu.memory_space<vmem>>, vector<1x96xf32>
      %14 = vector.broadcast %13 : vector<1x96xf32> to vector<16x96xf32>
      %15 = arith.addf %12, %14 : vector<16x96xf32>
      %16 = arith.truncf %15 : vector<16x96xf32> to vector<16x96xbf16>
      %c0_14 = arith.constant 0 : index
      %c0_15 = arith.constant 0 : index
      %17 = vector.load %arg6[%c0_14, %c0_15] : memref<16x96xbf16, #tpu.memory_space<vmem>>, vector<16x96xbf16>
      tpu.vector_store %arg6[%c0_14, %c0_15], %16 {strides = array<i32>} : memref<16x96xbf16, #tpu.memory_space<vmem>>, vector<16x96xbf16>,
    } else {
    }
    return
  }
  func.func @transform_0(%arg0: i32, %arg1: i32, %arg2: i32) -> (i32, i32) {
    %c0_i32 = arith.constant 0 : i32
    return %arg0, %arg2 : i32, i32
  }
  func.func @transform_1(%arg0: i32, %arg1: i32, %arg2: i32) -> (i32, i32) {
    %c0_i32 = arith.constant 0 : i32
    return %arg2, %arg1 : i32, i32
  }
  func.func @transform_2(%arg0: i32, %arg1: i32, %arg2: i32) -> (i32, i32) {
    %c0_i32 = arith.constant 0 : i32
    %c0_i32_0 = arith.constant 0 : i32
    return %c0_i32, %arg1 : i32, i32
  }
  func.func @transform_3(%arg0: i32, %arg1: i32, %arg2: i32) -> (i32, i32) {
    %c0_i32 = arith.constant 0 : i32
    return %arg0, %arg1 : i32, i32
  }
}

module attributes {stable_mosaic.version = 11 : i64} {
  func.func @_dense_add_ln_kernel(%arg0: i32, %arg1: i32, %arg2: memref<16x32xbf16, #tpu.memory_space<vmem>>, %arg3: memref<32x32xbf16, #tpu.memory_space<vmem>>, %arg4: memref<1x32xf32, #tpu.memory_space<vmem>>, %arg5: memref<16x32xbf16, #tpu.memory_space<vmem>>, %arg6: memref<1x32xf32, #tpu.memory_space<vmem>>, %arg7: memref<1x32xf32, #tpu.memory_space<vmem>>, %arg8: memref<16x32xbf16, #tpu.memory_space<vmem>>, %arg9: memref<16x32xf32, #tpu.memory_space<vmem>>) attributes {dimension_semantics = [#tpu.dimension_semantics<parallel>, #tpu.dimension_semantics<arbitrary>], iteration_bounds = array<i64: 1, 1>, scalar_prefetch = 0 : i64, scratch_operands = 1 : i64, tpu.core_type = #tpu.core_type<tc>, window_params = [{transform_indices = @transform_0, window_bounds = array<i64: 16, 32>}, {transform_indices = @transform_1, window_bounds = array<i64: 32, 32>}, {pipeline_mode = #tpu.pipeline_mode<synchronous>, transform_indices = @transform_2, window_bounds = array<i64: 1, 32>}, {transform_indices = @transform_3, window_bounds = array<i64: 16, 32>}, {pipeline_mode = #tpu.pipeline_mode<synchronous>, transform_indices = @transform_4, window_bounds = array<i64: 1, 32>}, {pipeline_mode = #tpu.pipeline_mode<synchronous>, transform_indices = @transform_5, window_bounds = array<i64: 1, 32>}, {transform_indices = @transform_6, window_bounds = array<i64: 16, 32>}]} {
    %c0_i32 = arith.constant 0 : i32
    %0 = arith.cmpi eq, %arg1, %c0_i32 : i32
    %1 = arith.extui %0 : i1 to i32
    %c0_i32_0 = arith.constant 0 : i32
    %2 = arith.cmpi ne, %1, %c0_i32_0 : i32
    scf.if %2 {
      %cst_10 = arith.constant 0.000000e+00 : f32
      %12 = vector.broadcast %cst_10 : f32 to vector<16x32xf32>
      %c0_11 = arith.constant 0 : index
      %c0_12 = arith.constant 0 : index
      %13 = vector.load %arg9[%c0_11, %c0_12] : memref<16x32xf32, #tpu.memory_space<vmem>>, vector<16x32xf32>
      tpu.vector_store %arg9[%c0_11, %c0_12], %12 {strides = array<i32>} : memref<16x32xf32, #tpu.memory_space<vmem>>, vector<16x32xf32>,
    } else {
    }
    %c0 = arith.constant 0 : index
    %c0_1 = arith.constant 0 : index
    %3 = vector.load %arg9[%c0, %c0_1] : memref<16x32xf32, #tpu.memory_space<vmem>>, vector<16x32xf32>
    %c0_2 = arith.constant 0 : index
    %c0_3 = arith.constant 0 : index
    %4 = vector.load %arg2[%c0_2, %c0_3] : memref<16x32xbf16, #tpu.memory_space<vmem>>, vector<16x32xbf16>
    %c0_4 = arith.constant 0 : index
    %c0_5 = arith.constant 0 : index
    %5 = vector.load %arg3[%c0_4, %c0_5] : memref<32x32xbf16, #tpu.memory_space<vmem>>, vector<32x32xbf16>
    %cst = arith.constant dense<0.000000e+00> : vector<16x32xf32>
    %6 = tpu.matmul %4, %5, %cst {dimension_numbers = #tpu.dot_dimension_numbers<[1], [0], [0], [1], [0, 0, 1, 1], [], []>} : vector<16x32xbf16>, vector<32x32xbf16>, vector<16x32xf32> -> vector<16x32xf32>
    %7 = arith.addf %3, %6 : vector<16x32xf32>
    %c0_6 = arith.constant 0 : index
    %c0_7 = arith.constant 0 : index
    %8 = vector.load %arg9[%c0_6, %c0_7] : memref<16x32xf32, #tpu.memory_space<vmem>>, vector<16x32xf32>
    tpu.vector_store %arg9[%c0_6, %c0_7], %7 {strides = array<i32>} : memref<16x32xf32, #tpu.memory_space<vmem>>, vector<16x32xf32>,
    %c0_i32_8 = arith.constant 0 : i32
    %9 = arith.cmpi eq, %arg1, %c0_i32_8 : i32
    %10 = arith.extui %9 : i1 to i32
    %c0_i32_9 = arith.constant 0 : i32
    %11 = arith.cmpi ne, %10, %c0_i32_9 : i32
    scf.if %11 {
      %c0_10 = arith.constant 0 : index
      %c0_11 = arith.constant 0 : index
      %12 = vector.load %arg9[%c0_10, %c0_11] : memref<16x32xf32, #tpu.memory_space<vmem>>, vector<16x32xf32>
      %c0_12 = arith.constant 0 : index
      %c0_13 = arith.constant 0 : index
      %13 = vector.load %arg4[%c0_12, %c0_13] : memref<1x32xf32, #tpu.memory_space<vmem>>, vector<1x32xf32>
      %14 = vector.broadcast %13 : vector<1x32xf32> to vector<16x32xf32>
      %15 = arith.addf %12, %14 : vector<16x32xf32>
      %c0_14 = arith.constant 0 : index
      %c0_15 = arith.constant 0 : index
      %16 = vector.load %arg5[%c0_14, %c0_15] : memref<16x32xbf16, #tpu.memory_space<vmem>>, vector<16x32xbf16>
      %17 = arith.extf %16 : vector<16x32xbf16> to vector<16x32xf32>
      %18 = arith.addf %15, %17 : vector<16x32xf32>
      %cst_16 = arith.constant dense<0.000000e+00> : vector<16xf32>
      %19 = vector.multi_reduction <add>, %18, %cst_16 [1] : vector<16x32xf32> to vector<16xf32>
      %20 = vector.shape_cast %19 : vector<16xf32> to vector<16x1xf32>
      %cst_17 = arith.constant 3.200000e+01 : f32
      %21 = vector.broadcast %cst_17 : f32 to vector<16x1xf32>
      %22 = arith.divf %20, %21 : vector<16x1xf32>
      %23 = vector.broadcast %22 : vector<16x1xf32> to vector<16x32xf32>
      %24 = arith.subf %18, %23 : vector<16x32xf32>
      %25 = arith.mulf %24, %24 : vector<16x32xf32>
      %cst_18 = arith.constant dense<0.000000e+00> : vector<16xf32>
      %26 = vector.multi_reduction <add>, %25, %cst_18 [1] : vector<16x32xf32> to vector<16xf32>
      %27 = vector.shape_cast %26 : vector<16xf32> to vector<16x1xf32>
      %cst_19 = arith.constant 3.200000e+01 : f32
      %28 = vector.broadcast %cst_19 : f32 to vector<16x1xf32>
      %29 = arith.divf %27, %28 : vector<16x1xf32>
      %cst_20 = arith.constant 9.99999996E-13 : f32
      %30 = vector.broadcast %cst_20 : f32 to vector<16x1xf32>
      %31 = arith.addf %29, %30 : vector<16x1xf32>
      %32 = math.rsqrt %31 : vector<16x1xf32>
      %33 = vector.broadcast %32 : vector<16x1xf32> to vector<16x32xf32>
      %34 = arith.mulf %24, %33 : vector<16x32xf32>
      %c0_21 = arith.constant 0 : index
      %c0_22 = arith.constant 0 : index
      %35 = vector.load %arg6[%c0_21, %c0_22] : memref<1x32xf32, #tpu.memory_space<vmem>>, vector<1x32xf32>
      %36 = vector.broadcast %35 : vector<1x32xf32> to vector<16x32xf32>
      %37 = arith.mulf %34, %36 : vector<16x32xf32>
      %c0_23 = arith.constant 0 : index
      %c0_24 = arith.constant 0 : index
      %38 = vector.load %arg7[%c0_23, %c0_24] : memref<1x32xf32, #tpu.memory_space<vmem>>, vector<1x32xf32>
      %39 = vector.broadcast %38 : vector<1x32xf32> to vector<16x32xf32>
      %40 = arith.addf %37, %39 : vector<16x32xf32>
      %41 = arith.truncf %40 : vector<16x32xf32> to vector<16x32xbf16>
      %c0_25 = arith.constant 0 : index
      %c0_26 = arith.constant 0 : index
      %42 = vector.load %arg8[%c0_25, %c0_26] : memref<16x32xbf16, #tpu.memory_space<vmem>>, vector<16x32xbf16>
      tpu.vector_store %arg8[%c0_25, %c0_26], %41 {strides = array<i32>} : memref<16x32xbf16, #tpu.memory_space<vmem>>, vector<16x32xbf16>,
    } else {
    }
    return
  }
  func.func @transform_0(%arg0: i32, %arg1: i32) -> (i32, i32) {
    %c0_i32 = arith.constant 0 : i32
    return %arg0, %arg1 : i32, i32
  }
  func.func @transform_1(%arg0: i32, %arg1: i32) -> (i32, i32) {
    %c0_i32 = arith.constant 0 : i32
    %c0_i32_0 = arith.constant 0 : i32
    return %arg1, %c0_i32 : i32, i32
  }
  func.func @transform_2(%arg0: i32, %arg1: i32) -> (i32, i32) {
    %c0_i32 = arith.constant 0 : i32
    %c0_i32_0 = arith.constant 0 : i32
    %c0_i32_1 = arith.constant 0 : i32
    return %c0_i32, %c0_i32_0 : i32, i32
  }
  func.func @transform_3(%arg0: i32, %arg1: i32) -> (i32, i32) {
    %c0_i32 = arith.constant 0 : i32
    %c0_i32_0 = arith.constant 0 : i32
    return %arg0, %c0_i32 : i32, i32
  }
  func.func @transform_4(%arg0: i32, %arg1: i32) -> (i32, i32) {
    %c0_i32 = arith.constant 0 : i32
    %c0_i32_0 = arith.constant 0 : i32
    %c0_i32_1 = arith.constant 0 : i32
    return %c0_i32, %c0_i32_0 : i32, i32
  }
  func.func @transform_5(%arg0: i32, %arg1: i32) -> (i32, i32) {
    %c0_i32 = arith.constant 0 : i32
    %c0_i32_0 = arith.constant 0 : i32
    %c0_i32_1 = arith.constant 0 : i32
    return %c0_i32, %c0_i32_0 : i32, i32
  }
  func.func @transform_6(%arg0: i32, %arg1: i32) -> (i32, i32) {
    %c0_i32 = arith.constant 0 : i32
    %c0_i32_0 = arith.constant 0 : i32
    return %arg0, %c0_i32 : i32, i32
  }
}

module attributes {stable_mosaic.version = 11 : i64} {
  func.func @_mha_kernel(%arg0: i32, %arg1: memref<1x8x32xbf16, #tpu.memory_space<vmem>>, %arg2: memref<1x8x32xbf16, #tpu.memory_space<vmem>>, %arg3: memref<1x8x32xbf16, #tpu.memory_space<vmem>>, %arg4: memref<1x1x8xf32, #tpu.memory_space<vmem>>, %arg5: memref<1x8x32xbf16, #tpu.memory_space<vmem>>) attributes {dimension_semantics = [#tpu.dimension_semantics<parallel>], iteration_bounds = array<i64: 2>, scalar_prefetch = 0 : i64, scratch_operands = 0 : i64, tpu.core_type = #tpu.core_type<tc>, window_params = [{transform_indices = @transform_0, window_bounds = array<i64: 1, 8, 32>}, {transform_indices = @transform_1, window_bounds = array<i64: 1, 8, 32>}, {transform_indices = @transform_2, window_bounds = array<i64: 1, 8, 32>}, {transform_indices = @transform_3, window_bounds = array<i64: 1, 1, 8>}, {transform_indices = @transform_4, window_bounds = array<i64: 1, 8, 32>}]} {
    %c0 = arith.constant 0 : index
    %c0_0 = arith.constant 0 : index
    %c0_1 = arith.constant 0 : index
    %0 = vector.load %arg1[%c0, %c0_0, %c0_1] : memref<1x8x32xbf16, #tpu.memory_space<vmem>>, vector<1x8x32xbf16>
    %1 = vector.shape_cast %0 : vector<1x8x32xbf16> to vector<8x32xbf16>
    %c0_2 = arith.constant 0 : index
    %c0_3 = arith.constant 0 : index
    %c0_4 = arith.constant 0 : index
    %2 = vector.load %arg2[%c0_2, %c0_3, %c0_4] : memref<1x8x32xbf16, #tpu.memory_space<vmem>>, vector<1x8x32xbf16>
    %3 = vector.shape_cast %2 : vector<1x8x32xbf16> to vector<8x32xbf16>
    %c0_5 = arith.constant 0 : index
    %c0_6 = arith.constant 0 : index
    %c0_7 = arith.constant 0 : index
    %4 = vector.load %arg3[%c0_5, %c0_6, %c0_7] : memref<1x8x32xbf16, #tpu.memory_space<vmem>>, vector<1x8x32xbf16>
    %5 = vector.shape_cast %4 : vector<1x8x32xbf16> to vector<8x32xbf16>
    %c0_8 = arith.constant 0 : index
    %c0_9 = arith.constant 0 : index
    %c0_10 = arith.constant 0 : index
    %6 = vector.load %arg4[%c0_8, %c0_9, %c0_10] : memref<1x1x8xf32, #tpu.memory_space<vmem>>, vector<1x1x8xf32>
    %7 = vector.shape_cast %6 : vector<1x1x8xf32> to vector<1x8xf32>
    %8 = vector.extract_strided_slice %1 {offsets = [0, 0], sizes = [8, 8], strides = [1, 1]} : vector<8x32xbf16> to vector<8x8xbf16>
    %9 = vector.extract_strided_slice %3 {offsets = [0, 0], sizes = [8, 8], strides = [1, 1]} : vector<8x32xbf16> to vector<8x8xbf16>
    %10 = vector.extract_strided_slice %5 {offsets = [0, 0], sizes = [8, 8], strides = [1, 1]} : vector<8x32xbf16> to vector<8x8xbf16>
    %cst = arith.constant dense<0.000000e+00> : vector<8x8xf32>
    %11 = tpu.matmul %8, %9, %cst {dimension_numbers = #tpu.dot_dimension_numbers<[1], [1], [0], [0], [0, 0, 1, 0], [], []>} : vector<8x8xbf16>, vector<8x8xbf16>, vector<8x8xf32> -> vector<8x8xf32>
    %cst_11 = arith.constant 0.353553385 : f32
    %12 = vector.broadcast %cst_11 : f32 to vector<8x8xf32>
    %13 = arith.mulf %11, %12 : vector<8x8xf32>
    %14 = vector.broadcast %7 : vector<1x8xf32> to vector<8x8xf32>
    %15 = arith.addf %13, %14 : vector<8x8xf32>
    %cst_12 = arith.constant dense<0xFF800000> : vector<8xf32>
    %16 = vector.multi_reduction <maximumf>, %15, %cst_12 [1] : vector<8x8xf32> to vector<8xf32>
    %17 = vector.shape_cast %16 : vector<8xf32> to vector<8x1xf32>
    %18 = vector.broadcast %17 : vector<8x1xf32> to vector<8x8xf32>
    %19 = arith.subf %15, %18 : vector<8x8xf32>
    %20 = math.exp %19 : vector<8x8xf32>
    %cst_13 = arith.constant dense<0.000000e+00> : vector<8xf32>
    %21 = vector.multi_reduction <add>, %20, %cst_13 [1] : vector<8x8xf32> to vector<8xf32>
    %22 = vector.shape_cast %21 : vector<8xf32> to vector<8x1xf32>
    %23 = tpu.reciprocal %22 {approx = true} : vector<8x1xf32> -> vector<8x1xf32>
    %24 = vector.broadcast %23 : vector<8x1xf32> to vector<8x8xf32>
    %25 = arith.mulf %20, %24 : vector<8x8xf32>
    %26 = arith.truncf %25 : vector<8x8xf32> to vector<8x8xbf16>
    %cst_14 = arith.constant dense<0.000000e+00> : vector<8x8xf32>
    %27 = tpu.matmul %26, %10, %cst_14 {dimension_numbers = #tpu.dot_dimension_numbers<[1], [0], [0], [1], [0, 0, 1, 1], [], []>} : vector<8x8xbf16>, vector<8x8xbf16>, vector<8x8xf32> -> vector<8x8xf32>
    %28 = vector.extract_strided_slice %1 {offsets = [0, 8], sizes = [8, 8], strides = [1, 1]} : vector<8x32xbf16> to vector<8x8xbf16>
    %29 = vector.extract_strided_slice %3 {offsets = [0, 8], sizes = [8, 8], strides = [1, 1]} : vector<8x32xbf16> to vector<8x8xbf16>
    %30 = vector.extract_strided_slice %5 {offsets = [0, 8], sizes = [8, 8], strides = [1, 1]} : vector<8x32xbf16> to vector<8x8xbf16>
    %cst_15 = arith.constant dense<0.000000e+00> : vector<8x8xf32>
    %31 = tpu.matmul %28, %29, %cst_15 {dimension_numbers = #tpu.dot_dimension_numbers<[1], [1], [0], [0], [0, 0, 1, 0], [], []>} : vector<8x8xbf16>, vector<8x8xbf16>, vector<8x8xf32> -> vector<8x8xf32>
    %cst_16 = arith.constant 0.353553385 : f32
    %32 = vector.broadcast %cst_16 : f32 to vector<8x8xf32>
    %33 = arith.mulf %31, %32 : vector<8x8xf32>
    %34 = vector.broadcast %7 : vector<1x8xf32> to vector<8x8xf32>
    %35 = arith.addf %33, %34 : vector<8x8xf32>
    %cst_17 = arith.constant dense<0xFF800000> : vector<8xf32>
    %36 = vector.multi_reduction <maximumf>, %35, %cst_17 [1] : vector<8x8xf32> to vector<8xf32>
    %37 = vector.shape_cast %36 : vector<8xf32> to vector<8x1xf32>
    %38 = vector.broadcast %37 : vector<8x1xf32> to vector<8x8xf32>
    %39 = arith.subf %35, %38 : vector<8x8xf32>
    %40 = math.exp %39 : vector<8x8xf32>
    %cst_18 = arith.constant dense<0.000000e+00> : vector<8xf32>
    %41 = vector.multi_reduction <add>, %40, %cst_18 [1] : vector<8x8xf32> to vector<8xf32>
    %42 = vector.shape_cast %41 : vector<8xf32> to vector<8x1xf32>
    %43 = tpu.reciprocal %42 {approx = true} : vector<8x1xf32> -> vector<8x1xf32>
    %44 = vector.broadcast %43 : vector<8x1xf32> to vector<8x8xf32>
    %45 = arith.mulf %40, %44 : vector<8x8xf32>
    %46 = arith.truncf %45 : vector<8x8xf32> to vector<8x8xbf16>
    %cst_19 = arith.constant dense<0.000000e+00> : vector<8x8xf32>
    %47 = tpu.matmul %46, %30, %cst_19 {dimension_numbers = #tpu.dot_dimension_numbers<[1], [0], [0], [1], [0, 0, 1, 1], [], []>} : vector<8x8xbf16>, vector<8x8xbf16>, vector<8x8xf32> -> vector<8x8xf32>
    %48 = vector.extract_strided_slice %1 {offsets = [0, 16], sizes = [8, 8], strides = [1, 1]} : vector<8x32xbf16> to vector<8x8xbf16>
    %49 = vector.extract_strided_slice %3 {offsets = [0, 16], sizes = [8, 8], strides = [1, 1]} : vector<8x32xbf16> to vector<8x8xbf16>
    %50 = vector.extract_strided_slice %5 {offsets = [0, 16], sizes = [8, 8], strides = [1, 1]} : vector<8x32xbf16> to vector<8x8xbf16>
    %cst_20 = arith.constant dense<0.000000e+00> : vector<8x8xf32>
    %51 = tpu.matmul %48, %49, %cst_20 {dimension_numbers = #tpu.dot_dimension_numbers<[1], [1], [0], [0], [0, 0, 1, 0], [], []>} : vector<8x8xbf16>, vector<8x8xbf16>, vector<8x8xf32> -> vector<8x8xf32>
    %cst_21 = arith.constant 0.353553385 : f32
    %52 = vector.broadcast %cst_21 : f32 to vector<8x8xf32>
    %53 = arith.mulf %51, %52 : vector<8x8xf32>
    %54 = vector.broadcast %7 : vector<1x8xf32> to vector<8x8xf32>
    %55 = arith.addf %53, %54 : vector<8x8xf32>
    %cst_22 = arith.constant dense<0xFF800000> : vector<8xf32>
    %56 = vector.multi_reduction <maximumf>, %55, %cst_22 [1] : vector<8x8xf32> to vector<8xf32>
    %57 = vector.shape_cast %56 : vector<8xf32> to vector<8x1xf32>
    %58 = vector.broadcast %57 : vector<8x1xf32> to vector<8x8xf32>
    %59 = arith.subf %55, %58 : vector<8x8xf32>
    %60 = math.exp %59 : vector<8x8xf32>
    %cst_23 = arith.constant dense<0.000000e+00> : vector<8xf32>
    %61 = vector.multi_reduction <add>, %60, %cst_23 [1] : vector<8x8xf32> to vector<8xf32>
    %62 = vector.shape_cast %61 : vector<8xf32> to vector<8x1xf32>
    %63 = tpu.reciprocal %62 {approx = true} : vector<8x1xf32> -> vector<8x1xf32>
    %64 = vector.broadcast %63 : vector<8x1xf32> to vector<8x8xf32>
    %65 = arith.mulf %60, %64 : vector<8x8xf32>
    %66 = arith.truncf %65 : vector<8x8xf32> to vector<8x8xbf16>
    %cst_24 = arith.constant dense<0.000000e+00> : vector<8x8xf32>
    %67 = tpu.matmul %66, %50, %cst_24 {dimension_numbers = #tpu.dot_dimension_numbers<[1], [0], [0], [1], [0, 0, 1, 1], [], []>} : vector<8x8xbf16>, vector<8x8xbf16>, vector<8x8xf32> -> vector<8x8xf32>
    %68 = vector.extract_strided_slice %1 {offsets = [0, 24], sizes = [8, 8], strides = [1, 1]} : vector<8x32xbf16> to vector<8x8xbf16>
    %69 = vector.extract_strided_slice %3 {offsets = [0, 24], sizes = [8, 8], strides = [1, 1]} : vector<8x32xbf16> to vector<8x8xbf16>
    %70 = vector.extract_strided_slice %5 {offsets = [0, 24], sizes = [8, 8], strides = [1, 1]} : vector<8x32xbf16> to vector<8x8xbf16>
    %cst_25 = arith.constant dense<0.000000e+00> : vector<8x8xf32>
    %71 = tpu.matmul %68, %69, %cst_25 {dimension_numbers = #tpu.dot_dimension_numbers<[1], [1], [0], [0], [0, 0, 1, 0], [], []>} : vector<8x8xbf16>, vector<8x8xbf16>, vector<8x8xf32> -> vector<8x8xf32>
    %cst_26 = arith.constant 0.353553385 : f32
    %72 = vector.broadcast %cst_26 : f32 to vector<8x8xf32>
    %73 = arith.mulf %71, %72 : vector<8x8xf32>
    %74 = vector.broadcast %7 : vector<1x8xf32> to vector<8x8xf32>
    %75 = arith.addf %73, %74 : vector<8x8xf32>
    %cst_27 = arith.constant dense<0xFF800000> : vector<8xf32>
    %76 = vector.multi_reduction <maximumf>, %75, %cst_27 [1] : vector<8x8xf32> to vector<8xf32>
    %77 = vector.shape_cast %76 : vector<8xf32> to vector<8x1xf32>
    %78 = vector.broadcast %77 : vector<8x1xf32> to vector<8x8xf32>
    %79 = arith.subf %75, %78 : vector<8x8xf32>
    %80 = math.exp %79 : vector<8x8xf32>
    %cst_28 = arith.constant dense<0.000000e+00> : vector<8xf32>
    %81 = vector.multi_reduction <add>, %80, %cst_28 [1] : vector<8x8xf32> to vector<8xf32>
    %82 = vector.shape_cast %81 : vector<8xf32> to vector<8x1xf32>
    %83 = tpu.reciprocal %82 {approx = true} : vector<8x1xf32> -> vector<8x1xf32>
    %84 = vector.broadcast %83 : vector<8x1xf32> to vector<8x8xf32>
    %85 = arith.mulf %80, %84 : vector<8x8xf32>
    %86 = arith.truncf %85 : vector<8x8xf32> to vector<8x8xbf16>
    %cst_29 = arith.constant dense<0.000000e+00> : vector<8x8xf32>
    %87 = tpu.matmul %86, %70, %cst_29 {dimension_numbers = #tpu.dot_dimension_numbers<[1], [0], [0], [1], [0, 0, 1, 1], [], []>} : vector<8x8xbf16>, vector<8x8xbf16>, vector<8x8xf32> -> vector<8x8xf32>
    %88 = tpu.concatenate %27, %47, %67, %87 in 1 : vector<8x8xf32>, vector<8x8xf32>, vector<8x8xf32>, vector<8x8xf32> -> vector<8x32xf32>
    %89 = arith.truncf %88 : vector<8x32xf32> to vector<8x32xbf16>
    %c0_30 = arith.constant 0 : index
    %c0_31 = arith.constant 0 : index
    %c0_32 = arith.constant 0 : index
    %90 = vector.load %arg5[%c0_30, %c0_31, %c0_32] : memref<1x8x32xbf16, #tpu.memory_space<vmem>>, vector<1x8x32xbf16>
    %91 = vector.shape_cast %90 : vector<1x8x32xbf16> to vector<8x32xbf16>
    %92 = vector.shape_cast %89 : vector<8x32xbf16> to vector<1x8x32xbf16>
    tpu.vector_store %arg5[%c0_30, %c0_31, %c0_32], %92 {strides = array<i32>} : memref<1x8x32xbf16, #tpu.memory_space<vmem>>, vector<1x8x32xbf16>,
    return
  }
  func.func @transform_0(%arg0: i32) -> (i32, i32, i32) {
    %c0_i32 = arith.constant 0 : i32
    %c0_i32_0 = arith.constant 0 : i32
    %c0_i32_1 = arith.constant 0 : i32
    return %arg0, %c0_i32, %c0_i32_0 : i32, i32, i32
  }
  func.func @transform_1(%arg0: i32) -> (i32, i32, i32) {
    %c0_i32 = arith.constant 0 : i32
    %c0_i32_0 = arith.constant 0 : i32
    %c0_i32_1 = arith.constant 0 : i32
    return %arg0, %c0_i32, %c0_i32_0 : i32, i32, i32
  }
  func.func @transform_2(%arg0: i32) -> (i32, i32, i32) {
    %c0_i32 = arith.constant 0 : i32
    %c0_i32_0 = arith.constant 0 : i32
    %c0_i32_1 = arith.constant 0 : i32
    return %arg0, %c0_i32, %c0_i32_0 : i32, i32, i32
  }
  func.func @transform_3(%arg0: i32) -> (i32, i32, i32) {
    %c0_i32 = arith.constant 0 : i32
    %c0_i32_0 = arith.constant 0 : i32
    %c0_i32_1 = arith.constant 0 : i32
    return %arg0, %c0_i32, %c0_i32_0 : i32, i32, i32
  }
  func.func @transform_4(%arg0: i32) -> (i32, i32, i32) {
    %c0_i32 = arith.constant 0 : i32
    %c0_i32_0 = arith.constant 0 : i32
    %c0_i32_1 = arith.constant 0 : i32
    return %arg0, %c0_i32, %c0_i32_0 : i32, i32, i32
  }
}

module attributes {stable_mosaic.version = 11 : i64} {
  func.func @_dense_kernel(%arg0: i32, %arg1: i32, %arg2: i32, %arg3: memref<16x32xbf16, #tpu.memory_space<vmem>>, %arg4: memref<32x64xbf16, #tpu.memory_space<vmem>>, %arg5: memref<1x64xf32, #tpu.memory_space<vmem>>, %arg6: memref<16x64xbf16, #tpu.memory_space<vmem>>, %arg7: memref<16x64xf32, #tpu.memory_space<vmem>>) attributes {dimension_semantics = [#tpu.dimension_semantics<parallel>, #tpu.dimension_semantics<parallel>, #tpu.dimension_semantics<arbitrary>], iteration_bounds = array<i64: 1, 1, 1>, scalar_prefetch = 0 : i64, scratch_operands = 1 : i64, tpu.core_type = #tpu.core_type<tc>, window_params = [{transform_indices = @transform_0, window_bounds = array<i64: 16, 32>}, {transform_indices = @transform_1, window_bounds = array<i64: 32, 64>}, {transform_indices = @transform_2, window_bounds = array<i64: 1, 64>}, {transform_indices = @transform_3, window_bounds = array<i64: 16, 64>}]} {
    %c0_i32 = arith.constant 0 : i32
    %0 = arith.cmpi eq, %arg2, %c0_i32 : i32
    %1 = arith.extui %0 : i1 to i32
    %c0_i32_0 = arith.constant 0 : i32
    %2 = arith.cmpi ne, %1, %c0_i32_0 : i32
    scf.if %2 {
      %cst_10 = arith.constant 0.000000e+00 : f32
      %12 = vector.broadcast %cst_10 : f32 to vector<16x64xf32>
      %c0_11 = arith.constant 0 : index
      %c0_12 = arith.constant 0 : index
      %13 = vector.load %arg7[%c0_11, %c0_12] : memref<16x64xf32, #tpu.memory_space<vmem>>, vector<16x64xf32>
      tpu.vector_store %arg7[%c0_11, %c0_12], %12 {strides = array<i32>} : memref<16x64xf32, #tpu.memory_space<vmem>>, vector<16x64xf32>,
    } else {
    }
    %c0 = arith.constant 0 : index
    %c0_1 = arith.constant 0 : index
    %3 = vector.load %arg7[%c0, %c0_1] : memref<16x64xf32, #tpu.memory_space<vmem>>, vector<16x64xf32>
    %c0_2 = arith.constant 0 : index
    %c0_3 = arith.constant 0 : index
    %4 = vector.load %arg3[%c0_2, %c0_3] : memref<16x32xbf16, #tpu.memory_space<vmem>>, vector<16x32xbf16>
    %c0_4 = arith.constant 0 : index
    %c0_5 = arith.constant 0 : index
    %5 = vector.load %arg4[%c0_4, %c0_5] : memref<32x64xbf16, #tpu.memory_space<vmem>>, vector<32x64xbf16>
    %cst = arith.constant dense<0.000000e+00> : vector<16x64xf32>
    %6 = tpu.matmul %4, %5, %cst {dimension_numbers = #tpu.dot_dimension_numbers<[1], [0], [0], [1], [0, 0, 1, 1], [], []>} : vector<16x32xbf16>, vector<32x64xbf16>, vector<16x64xf32> -> vector<16x64xf32>
    %7 = arith.addf %3, %6 : vector<16x64xf32>
    %c0_6 = arith.constant 0 : index
    %c0_7 = arith.constant 0 : index
    %8 = vector.load %arg7[%c0_6, %c0_7] : memref<16x64xf32, #tpu.memory_space<vmem>>, vector<16x64xf32>
    tpu.vector_store %arg7[%c0_6, %c0_7], %7 {strides = array<i32>} : memref<16x64xf32, #tpu.memory_space<vmem>>, vector<16x64xf32>,
    %c0_i32_8 = arith.constant 0 : i32
    %9 = arith.cmpi eq, %arg2, %c0_i32_8 : i32
    %10 = arith.extui %9 : i1 to i32
    %c0_i32_9 = arith.constant 0 : i32
    %11 = arith.cmpi ne, %10, %c0_i32_9 : i32
    scf.if %11 {
      %c0_10 = arith.constant 0 : index
      %c0_11 = arith.constant 0 : index
      %12 = vector.load %arg7[%c0_10, %c0_11] : memref<16x64xf32, #tpu.memory_space<vmem>>, vector<16x64xf32>
      %c0_12 = arith.constant 0 : index
      %c0_13 = arith.constant 0 : index
      %13 = vector.load %arg5[%c0_12, %c0_13] : memref<1x64xf32, #tpu.memory_space<vmem>>, vector<1x64xf32>
      %14 = vector.broadcast %13 : vector<1x64xf32> to vector<16x64xf32>
      %15 = arith.addf %12, %14 : vector<16x64xf32>
      %cst_14 = arith.constant 5.000000e-01 : f32
      %16 = vector.broadcast %cst_14 : f32 to vector<16x64xf32>
      %17 = arith.mulf %16, %15 : vector<16x64xf32>
      %cst_15 = arith.constant 4.471500e-02 : f32
      %18 = vector.broadcast %cst_15 : f32 to vector<16x64xf32>
      %19 = arith.mulf %18, %15 : vector<16x64xf32>
      %20 = arith.mulf %19, %15 : vector<16x64xf32>
      %21 = arith.mulf %20, %15 : vector<16x64xf32>
      %22 = arith.addf %15, %21 : vector<16x64xf32>
      %cst_16 = arith.constant 0.797884583 : f32
      %23 = vector.broadcast %cst_16 : f32 to vector<16x64xf32>
      %24 = arith.mulf %23, %22 : vector<16x64xf32>
      %25 = math.tanh %24 : vector<16x64xf32>
      %cst_17 = arith.constant 1.000000e+00 : f32
      %26 = vector.broadcast %cst_17 : f32 to vector<16x64xf32>
      %27 = arith.addf %26, %25 : vector<16x64xf32>
      %28 = arith.mulf %17, %27 : vector<16x64xf32>
      %29 = arith.truncf %28 : vector<16x64xf32> to vector<16x64xbf16>
      %c0_18 = arith.constant 0 : index
      %c0_19 = arith.constant 0 : index
      %30 = vector.load %arg6[%c0_18, %c0_19] : memref<16x64xbf16, #tpu.memory_space<vmem>>, vector<16x64xbf16>
      tpu.vector_store %arg6[%c0_18, %c0_19], %29 {strides = array<i32>} : memref<16x64xbf16, #tpu.memory_space<vmem>>, vector<16x64xbf16>,
    } else {
    }
    return
  }
  func.func @transform_0(%arg0: i32, %arg1: i32, %arg2: i32) -> (i32, i32) {
    %c0_i32 = arith.constant 0 : i32
    return %arg0, %arg2 : i32, i32
  }
  func.func @transform_1(%arg0: i32, %arg1: i32, %arg2: i32) -> (i32, i32) {
    %c0_i32 = arith.constant 0 : i32
    return %arg2, %arg1 : i32, i32
  }
  func.func @transform_2(%arg0: i32, %arg1: i32, %arg2: i32) -> (i32, i32) {
    %c0_i32 = arith.constant 0 : i32
    %c0_i32_0 = arith.constant 0 : i32
    return %c0_i32, %arg1 : i32, i32
  }
  func.func @transform_3(%arg0: i32, %arg1: i32, %arg2: i32) -> (i32, i32) {
    %c0_i32 = arith.constant 0 : i32
    return %arg0, %arg1 : i32, i32
  }
}

module attributes {stable_mosaic.version = 11 : i64} {
  func.func @_dense_add_ln_kernel(%arg0: i32, %arg1: i32, %arg2: memref<16x64xbf16, #tpu.memory_space<vmem>>, %arg3: memref<64x32xbf16, #tpu.memory_space<vmem>>, %arg4: memref<1x32xf32, #tpu.memory_space<vmem>>, %arg5: memref<16x32xbf16, #tpu.memory_space<vmem>>, %arg6: memref<1x32xf32, #tpu.memory_space<vmem>>, %arg7: memref<1x32xf32, #tpu.memory_space<vmem>>, %arg8: memref<16x32xbf16, #tpu.memory_space<vmem>>, %arg9: memref<16x32xf32, #tpu.memory_space<vmem>>) attributes {dimension_semantics = [#tpu.dimension_semantics<parallel>, #tpu.dimension_semantics<arbitrary>], iteration_bounds = array<i64: 1, 1>, scalar_prefetch = 0 : i64, scratch_operands = 1 : i64, tpu.core_type = #tpu.core_type<tc>, window_params = [{transform_indices = @transform_0, window_bounds = array<i64: 16, 64>}, {transform_indices = @transform_1, window_bounds = array<i64: 64, 32>}, {pipeline_mode = #tpu.pipeline_mode<synchronous>, transform_indices = @transform_2, window_bounds = array<i64: 1, 32>}, {transform_indices = @transform_3, window_bounds = array<i64: 16, 32>}, {pipeline_mode = #tpu.pipeline_mode<synchronous>, transform_indices = @transform_4, window_bounds = array<i64: 1, 32>}, {pipeline_mode = #tpu.pipeline_mode<synchronous>, transform_indices = @transform_5, window_bounds = array<i64: 1, 32>}, {transform_indices = @transform_6, window_bounds = array<i64: 16, 32>}]} {
    %c0_i32 = arith.constant 0 : i32
    %0 = arith.cmpi eq, %arg1, %c0_i32 : i32
    %1 = arith.extui %0 : i1 to i32
    %c0_i32_0 = arith.constant 0 : i32
    %2 = arith.cmpi ne, %1, %c0_i32_0 : i32
    scf.if %2 {
      %cst_10 = arith.constant 0.000000e+00 : f32
      %12 = vector.broadcast %cst_10 : f32 to vector<16x32xf32>
      %c0_11 = arith.constant 0 : index
      %c0_12 = arith.constant 0 : index
      %13 = vector.load %arg9[%c0_11, %c0_12] : memref<16x32xf32, #tpu.memory_space<vmem>>, vector<16x32xf32>
      tpu.vector_store %arg9[%c0_11, %c0_12], %12 {strides = array<i32>} : memref<16x32xf32, #tpu.memory_space<vmem>>, vector<16x32xf32>,
    } else {
    }
    %c0 = arith.constant 0 : index
    %c0_1 = arith.constant 0 : index
    %3 = vector.load %arg9[%c0, %c0_1] : memref<16x32xf32, #tpu.memory_space<vmem>>, vector<16x32xf32>
    %c0_2 = arith.constant 0 : index
    %c0_3 = arith.constant 0 : index
    %4 = vector.load %arg2[%c0_2, %c0_3] : memref<16x64xbf16, #tpu.memory_space<vmem>>, vector<16x64xbf16>
    %c0_4 = arith.constant 0 : index
    %c0_5 = arith.constant 0 : index
    %5 = vector.load %arg3[%c0_4, %c0_5] : memref<64x32xbf16, #tpu.memory_space<vmem>>, vector<64x32xbf16>
    %cst = arith.constant dense<0.000000e+00> : vector<16x32xf32>
    %6 = tpu.matmul %4, %5, %cst {dimension_numbers = #tpu.dot_dimension_numbers<[1], [0], [0], [1], [0, 0, 1, 1], [], []>} : vector<16x64xbf16>, vector<64x32xbf16>, vector<16x32xf32> -> vector<16x32xf32>
    %7 = arith.addf %3, %6 : vector<16x32xf32>
    %c0_6 = arith.constant 0 : index
    %c0_7 = arith.constant 0 : index
    %8 = vector.load %arg9[%c0_6, %c0_7] : memref<16x32xf32, #tpu.memory_space<vmem>>, vector<16x32xf32>
    tpu.vector_store %arg9[%c0_6, %c0_7], %7 {strides = array<i32>} : memref<16x32xf32, #tpu.memory_space<vmem>>, vector<16x32xf32>,
    %c0_i32_8 = arith.constant 0 : i32
    %9 = arith.cmpi eq, %arg1, %c0_i32_8 : i32
    %10 = arith.extui %9 : i1 to i32
    %c0_i32_9 = arith.constant 0 : i32
    %11 = arith.cmpi ne, %10, %c0_i32_9 : i32
    scf.if %11 {
      %c0_10 = arith.constant 0 : index
      %c0_11 = arith.constant 0 : index
      %12 = vector.load %arg9[%c0_10, %c0_11] : memref<16x32xf32, #tpu.memory_space<vmem>>, vector<16x32xf32>
      %c0_12 = arith.constant 0 : index
      %c0_13 = arith.constant 0 : index
      %13 = vector.load %arg4[%c0_12, %c0_13] : memref<1x32xf32, #tpu.memory_space<vmem>>, vector<1x32xf32>
      %14 = vector.broadcast %13 : vector<1x32xf32> to vector<16x32xf32>
      %15 = arith.addf %12, %14 : vector<16x32xf32>
      %c0_14 = arith.constant 0 : index
      %c0_15 = arith.constant 0 : index
      %16 = vector.load %arg5[%c0_14, %c0_15] : memref<16x32xbf16, #tpu.memory_space<vmem>>, vector<16x32xbf16>
      %17 = arith.extf %16 : vector<16x32xbf16> to vector<16x32xf32>
      %18 = arith.addf %15, %17 : vector<16x32xf32>
      %cst_16 = arith.constant dense<0.000000e+00> : vector<16xf32>
      %19 = vector.multi_reduction <add>, %18, %cst_16 [1] : vector<16x32xf32> to vector<16xf32>
      %20 = vector.shape_cast %19 : vector<16xf32> to vector<16x1xf32>
      %cst_17 = arith.constant 3.200000e+01 : f32
      %21 = vector.broadcast %cst_17 : f32 to vector<16x1xf32>
      %22 = arith.divf %20, %21 : vector<16x1xf32>
      %23 = vector.broadcast %22 : vector<16x1xf32> to vector<16x32xf32>
      %24 = arith.subf %18, %23 : vector<16x32xf32>
      %25 = arith.mulf %24, %24 : vector<16x32xf32>
      %cst_18 = arith.constant dense<0.000000e+00> : vector<16xf32>
      %26 = vector.multi_reduction <add>, %25, %cst_18 [1] : vector<16x32xf32> to vector<16xf32>
      %27 = vector.shape_cast %26 : vector<16xf32> to vector<16x1xf32>
      %cst_19 = arith.constant 3.200000e+01 : f32
      %28 = vector.broadcast %cst_19 : f32 to vector<16x1xf32>
      %29 = arith.divf %27, %28 : vector<16x1xf32>
      %cst_20 = arith.constant 9.99999996E-13 : f32
      %30 = vector.broadcast %cst_20 : f32 to vector<16x1xf32>
      %31 = arith.addf %29, %30 : vector<16x1xf32>
      %32 = math.rsqrt %31 : vector<16x1xf32>
      %33 = vector.broadcast %32 : vector<16x1xf32> to vector<16x32xf32>
      %34 = arith.mulf %24, %33 : vector<16x32xf32>
      %c0_21 = arith.constant 0 : index
      %c0_22 = arith.constant 0 : index
      %35 = vector.load %arg6[%c0_21, %c0_22] : memref<1x32xf32, #tpu.memory_space<vmem>>, vector<1x32xf32>
      %36 = vector.broadcast %35 : vector<1x32xf32> to vector<16x32xf32>
      %37 = arith.mulf %34, %36 : vector<16x32xf32>
      %c0_23 = arith.constant 0 : index
      %c0_24 = arith.constant 0 : index
      %38 = vector.load %arg7[%c0_23, %c0_24] : memref<1x32xf32, #tpu.memory_space<vmem>>, vector<1x32xf32>
      %39 = vector.broadcast %38 : vector<1x32xf32> to vector<16x32xf32>
      %40 = arith.addf %37, %39 : vector<16x32xf32>
      %41 = arith.truncf %40 : vector<16x32xf32> to vector<16x32xbf16>
      %c0_25 = arith.constant 0 : index
      %c0_26 = arith.constant 0 : index
      %42 = vector.load %arg8[%c0_25, %c0_26] : memref<16x32xbf16, #tpu.memory_space<vmem>>, vector<16x32xbf16>
      tpu.vector_store %arg8[%c0_25, %c0_26], %41 {strides = array<i32>} : memref<16x32xbf16, #tpu.memory_space<vmem>>, vector<16x32xbf16>,
    } else {
    }
    return
  }
  func.func @transform_0(%arg0: i32, %arg1: i32) -> (i32, i32) {
    %c0_i32 = arith.constant 0 : i32
    return %arg0, %arg1 : i32, i32
  }
  func.func @transform_1(%arg0: i32, %arg1: i32) -> (i32, i32) {
    %c0_i32 = arith.constant 0 : i32
    %c0_i32_0 = arith.constant 0 : i32
    return %arg1, %c0_i32 : i32, i32
  }
  func.func @transform_2(%arg0: i32, %arg1: i32) -> (i32, i32) {
    %c0_i32 = arith.constant 0 : i32
    %c0_i32_0 = arith.constant 0 : i32
    %c0_i32_1 = arith.constant 0 : i32
    return %c0_i32, %c0_i32_0 : i32, i32
  }
  func.func @transform_3(%arg0: i32, %arg1: i32) -> (i32, i32) {
    %c0_i32 = arith.constant 0 : i32
    %c0_i32_0 = arith.constant 0 : i32
    return %arg0, %c0_i32 : i32, i32
  }
  func.func @transform_4(%arg0: i32, %arg1: i32) -> (i32, i32) {
    %c0_i32 = arith.constant 0 : i32
    %c0_i32_0 = arith.constant 0 : i32
    %c0_i32_1 = arith.constant 0 : i32
    return %c0_i32, %c0_i32_0 : i32, i32
  }
  func.func @transform_5(%arg0: i32, %arg1: i32) -> (i32, i32) {
    %c0_i32 = arith.constant 0 : i32
    %c0_i32_0 = arith.constant 0 : i32
    %c0_i32_1 = arith.constant 0 : i32
    return %c0_i32, %c0_i32_0 : i32, i32
  }
  func.func @transform_6(%arg0: i32, %arg1: i32) -> (i32, i32) {
    %c0_i32 = arith.constant 0 : i32
    %c0_i32_0 = arith.constant 0 : i32
    return %arg0, %c0_i32 : i32, i32
  }
}

module attributes {stable_mosaic.version = 11 : i64} {
  func.func @_dense_kernel(%arg0: i32, %arg1: i32, %arg2: i32, %arg3: memref<2x32xbf16, #tpu.memory_space<vmem>>, %arg4: memref<32x32xbf16, #tpu.memory_space<vmem>>, %arg5: memref<1x32xf32, #tpu.memory_space<vmem>>, %arg6: memref<2x32xf32, #tpu.memory_space<vmem>>, %arg7: memref<2x32xf32, #tpu.memory_space<vmem>>) attributes {dimension_semantics = [#tpu.dimension_semantics<parallel>, #tpu.dimension_semantics<parallel>, #tpu.dimension_semantics<arbitrary>], iteration_bounds = array<i64: 1, 1, 1>, scalar_prefetch = 0 : i64, scratch_operands = 1 : i64, tpu.core_type = #tpu.core_type<tc>, window_params = [{transform_indices = @transform_0, window_bounds = array<i64: 2, 32>}, {transform_indices = @transform_1, window_bounds = array<i64: 32, 32>}, {transform_indices = @transform_2, window_bounds = array<i64: 1, 32>}, {transform_indices = @transform_3, window_bounds = array<i64: 2, 32>}]} {
    %c0_i32 = arith.constant 0 : i32
    %0 = arith.cmpi eq, %arg2, %c0_i32 : i32
    %1 = arith.extui %0 : i1 to i32
    %c0_i32_0 = arith.constant 0 : i32
    %2 = arith.cmpi ne, %1, %c0_i32_0 : i32
    scf.if %2 {
      %cst_10 = arith.constant 0.000000e+00 : f32
      %12 = vector.broadcast %cst_10 : f32 to vector<2x32xf32>
      %c0_11 = arith.constant 0 : index
      %c0_12 = arith.constant 0 : index
      %13 = vector.load %arg7[%c0_11, %c0_12] : memref<2x32xf32, #tpu.memory_space<vmem>>, vector<2x32xf32>
      tpu.vector_store %arg7[%c0_11, %c0_12], %12 {strides = array<i32>} : memref<2x32xf32, #tpu.memory_space<vmem>>, vector<2x32xf32>,
    } else {
    }
    %c0 = arith.constant 0 : index
    %c0_1 = arith.constant 0 : index
    %3 = vector.load %arg7[%c0, %c0_1] : memref<2x32xf32, #tpu.memory_space<vmem>>, vector<2x32xf32>
    %c0_2 = arith.constant 0 : index
    %c0_3 = arith.constant 0 : index
    %4 = vector.load %arg3[%c0_2, %c0_3] : memref<2x32xbf16, #tpu.memory_space<vmem>>, vector<2x32xbf16>
    %c0_4 = arith.constant 0 : index
    %c0_5 = arith.constant 0 : index
    %5 = vector.load %arg4[%c0_4, %c0_5] : memref<32x32xbf16, #tpu.memory_space<vmem>>, vector<32x32xbf16>
    %cst = arith.constant dense<0.000000e+00> : vector<2x32xf32>
    %6 = tpu.matmul %4, %5, %cst {dimension_numbers = #tpu.dot_dimension_numbers<[1], [0], [0], [1], [0, 0, 1, 1], [], []>} : vector<2x32xbf16>, vector<32x32xbf16>, vector<2x32xf32> -> vector<2x32xf32>
    %7 = arith.addf %3, %6 : vector<2x32xf32>
    %c0_6 = arith.constant 0 : index
    %c0_7 = arith.constant 0 : index
    %8 = vector.load %arg7[%c0_6, %c0_7] : memref<2x32xf32, #tpu.memory_space<vmem>>, vector<2x32xf32>
    tpu.vector_store %arg7[%c0_6, %c0_7], %7 {strides = array<i32>} : memref<2x32xf32, #tpu.memory_space<vmem>>, vector<2x32xf32>,
    %c0_i32_8 = arith.constant 0 : i32
    %9 = arith.cmpi eq, %arg2, %c0_i32_8 : i32
    %10 = arith.extui %9 : i1 to i32
    %c0_i32_9 = arith.constant 0 : i32
    %11 = arith.cmpi ne, %10, %c0_i32_9 : i32
    scf.if %11 {
      %c0_10 = arith.constant 0 : index
      %c0_11 = arith.constant 0 : index
      %12 = vector.load %arg7[%c0_10, %c0_11] : memref<2x32xf32, #tpu.memory_space<vmem>>, vector<2x32xf32>
      %c0_12 = arith.constant 0 : index
      %c0_13 = arith.constant 0 : index
      %13 = vector.load %arg5[%c0_12, %c0_13] : memref<1x32xf32, #tpu.memory_space<vmem>>, vector<1x32xf32>
      %14 = vector.broadcast %13 : vector<1x32xf32> to vector<2x32xf32>
      %15 = arith.addf %12, %14 : vector<2x32xf32>
      %16 = math.tanh %15 : vector<2x32xf32>
      %c0_14 = arith.constant 0 : index
      %c0_15 = arith.constant 0 : index
      %17 = vector.load %arg6[%c0_14, %c0_15] : memref<2x32xf32, #tpu.memory_space<vmem>>, vector<2x32xf32>
      tpu.vector_store %arg6[%c0_14, %c0_15], %16 {strides = array<i32>} : memref<2x32xf32, #tpu.memory_space<vmem>>, vector<2x32xf32>,
    } else {
    }
    return
  }
  func.func @transform_0(%arg0: i32, %arg1: i32, %arg2: i32) -> (i32, i32) {
    %c0_i32 = arith.constant 0 : i32
    return %arg0, %arg2 : i32, i32
  }
  func.func @transform_1(%arg0: i32, %arg1: i32, %arg2: i32) -> (i32, i32) {
    %c0_i32 = arith.constant 0 : i32
    return %arg2, %arg1 : i32, i32
  }
  func.func @transform_2(%arg0: i32, %arg1: i32, %arg2: i32) -> (i32, i32) {
    %c0_i32 = arith.constant 0 : i32
    %c0_i32_0 = arith.constant 0 : i32
    return %c0_i32, %arg1 : i32, i32
  }
  func.func @transform_3(%arg0: i32, %arg1: i32, %arg2: i32) -> (i32, i32) {
    %c0_i32 = arith.constant 0 : i32
    return %arg0, %arg1 : i32, i32
  }
}

</mosaic_0001>

<bundles_post_ra>
// kernel: bert_pooled_output.12
= control target key start
LH: loop header
LB: loop body
LE: loop exit
PB: predicated region body
PF: predicated region fallthrough
CT: control target
= control target key end

     0   :  { %vm16_vm0 = vcmask 261120   ;;  %vm70_vm1 = vcmask 257024   ;;  %s129_s0 = inlined_call_operand.vmem [shape: f32[16,32], index: 0, kind: input, shape index: {}]   ;;  %s130_s1 = inlined_call_operand.vmem [shape: f32[1,32], index: 1, kind: input, shape index: {}]   ;;  %s131_s2 = inlined_call_operand.vmem [shape: f32[1,32], index: 2, kind: input, shape index: {}]   ;;  %s132_s3 = inlined_call_operand.vmem [shape: bf16[16,32], index: 3, kind: output, shape index: {}]  }
   0x1   :  { %v14_v0 = vld [vmem:[%s129_s0] sm:$0xff]  ;;  %v15_v1 = vld [vmem:[%s129_s0 + $0x8] sm:$0xff] }
   0x2   :  { %v17_v2 = vsel %vm16_vm0, %v14_v0, 0.0  ;;  %v20_v3 = vsel %vm16_vm0, %v15_v1, 0.0  ;;  %v77_v21 = vld [vmem:[%s130_s1] ss:$0 sm:$0xff] }
   0x3   :  { %18 = vadd.xlane.f32.xlu0 %v17_v2  ;;  %v78_v23 = vld [vmem:[%s131_s2] ss:$0 sm:$0xff] }
   0x7   :  { %21 = vadd.xlane.f32.xlu0 %v20_v3 }
  0x90   :  { %v19_v4 = vpop.xlane.xlu0 %18 }
  0x91   :  { %v24_v5 = vmul.f32 0.03125, %v19_v4 }
  0x93   :  { %v26_v6 = vsub.f32 %v14_v0, %v24_v5 }
  0x94   :  { %v22_v7 = vpop.xlane.xlu0 %21 }
  0x95   :  { %v25_v8 = vmul.f32 0.03125, %v22_v7  ;;  %v28_v9 = vmul.f32 %v26_v6, %v26_v6 }
  0x97   :  { %v27_v10 = vsub.f32 %v15_v1, %v25_v8  ;;  %v30_v11 = vsel %vm16_vm0, %v28_v9, 0.0 }
  0x98   :  { %31 = vadd.xlane.f32.xlu1 %v30_v11 }
  0x99   :  { %v29_v12 = vmul.f32 %v27_v10, %v27_v10 }
  0x9b   :  { %v33_v13 = vsel %vm16_vm0, %v29_v12, 0.0 }
  0x9c   :  { %34 = vadd.xlane.f32.xlu1 %v33_v13 }
 0x125   :  { %v32_v14 = vpop.xlane.xlu1 %31 }
 0x126   :  { %v36_v15 = vmul.f32 0.03125, %v32_v14 }
 0x128   :  { %v38_v16 = vadd.f32 1e-12, %v36_v15 }
 0x129   :  { %v35_v17 = vpop.xlane.xlu1 %34 }
 0x12a   :  { %83 = vrsqrt.f32 %v38_v16  ;;  %v37_v18 = vmul.f32 0.03125, %v35_v17 }
 0x12c   :  { %v39_v19 = vadd.f32 1e-12, %v37_v18 }
 0x12e   :  { %85 = vrsqrt.f32 %v39_v19 }
 0x134   :  { %v84_v20 = vpop.eup %83 }
 0x135   :  { %v42_v22 = vmul.f32 %v84_v20, %v26_v6 }
 0x137   :  { %v51_v24 = vmul.f32 %v77_v21, %v42_v22 }
 0x138   :  { %v86_v25 = vpop.eup %85 }
 0x139   :  { %v60_v26 = vadd.f32 %v78_v23, %v51_v24  ;;  %v43_v27 = vmul.f32 %v86_v25, %v27_v10 }
 0x13b   :  { %v81_v28 = vpack.c.bf16 %v60_v26, %v60_v26  ;;  %v52_v29 = vmul.f32 %v77_v21, %v43_v27 }
 0x13d   :  { %71 = vst.msk [vmem:[%s132_s3] sm:$0xf] %vm70_vm1, %v81_v28  ;;  %v61_v30 = vadd.f32 %v78_v23, %v52_v29 }
 0x13f   :  { %v82_v31 = vpack.c.bf16 %v61_v30, %v61_v30 }
 0x141   :  { %72 = vst.msk [vmem:[%s132_s3 + $0x4] sm:$0xf] %vm70_vm1, %v82_v31 }

// kernel: bert_pooled_output.13
= control target key start
LH: loop header
LB: loop body
LE: loop exit
PB: predicated region body
PF: predicated region fallthrough
CT: control target
= control target key end

     0   :  { %vm19_vm0 = vcmask 785408   ;;  %v151_v0 = vmov 0.0   ;;  %vm152_vm1 = vmmov 0   ;;  %vm47_vm2 = vcmask 261120   ;;  %s195_s1 = inlined_call_operand.vmem [shape: bf16[32,96], index: 1, kind: input, shape index: {}]   ;;  %s196_s0 = inlined_call_operand.vmem [shape: bf16[16,32], index: 0, kind: input, shape index: {}]   ;;  %s197_s2 = inlined_call_operand.vmem [shape: f32[1,96], index: 2, kind: input, shape index: {}]   ;;  %s198_s3 = inlined_call_operand.vmem [shape: bf16[16,96], index: 3, kind: output, shape index: {}]  }
   0x1   :  { %138 = vmatprep.subr.bf16.mxu0 %v151_v0  ;;  %v148_v1 = vld [vmem:[%s195_s1] sm:$0xff]   ;;  %142 = vmatprep.mubr.msk.bf16.mxu0 %vm152_vm1, %v151_v0  ;;  %20 = vst.msk [vmem:[#allocation2] sm:$0xff] %vm19_vm0, %v151_v0  ;;  %21 = vst.msk [vmem:[#allocation2 + $0x8] sm:$0xff] %vm19_vm0, %v151_v0  ;;  %v149_v2 = vld [vmem:[%s195_s1 + $0x8] sm:$0xff]   ;;  %vm119_vm3 = vcmask 781312  }
   0x2   :  { %139 = vmatpush3.bf16.msra.mxu0 %v148_v1  ;;  %v150_v3 = vld [vmem:[%s196_s0] sm:$0xff]  }
   0x3   :  { %140 = vmatprep.subr.bf16.mxu0 %v151_v0  ;;  %v130_v12 = vld [vmem:[%s197_s2] ss:$0 sm:$0xff] }
   0x6   :  { %141 = vmatpush3.bf16.msra.mxu0 %v149_v2 }
   0x8   :  { %v22_v4 = vld [vmem:[#allocation2] sm:$0xff]  ;;  %v23_v6 = vld [vmem:[#allocation2 + $0x8] sm:$0xff] }
   0x9   :  { %143 = vmatmul.mubr.msk.bf16.vlgmr.msra.gmra.mrb[0].mxu0 %vm47_vm2, %v150_v3 }
  0xdc   :  { %v85_v5 = vpop.f32.mrb[0].mxu0 }
  0xdd   :  { %v92_v7 = vadd.f32 %v85_v5, %v22_v4  ;;  %v144_v8 = vpop.f32.mrb[1].mxu0 }
  0xde   :  { %v88_v9 = vpop.f32.mrb[2].mxu0 }
  0xdf   :  { %95 = vst.msk [vmem:[#allocation2] sm:$0xff] %vm19_vm0, %v92_v7  ;;  %v93_v10 = vadd.f32 %v88_v9, %v23_v6  ;;  %v145_v11 = vpop.f32.mrb[3].mxu0 }
  0xe1   :  { %96 = vst.msk [vmem:[#allocation2 + $0x8] sm:$0xff] %vm19_vm0, %v93_v10 }
  0xe6   :  { %v100_v13 = vld [vmem:[#allocation2] sm:$0xff] }
  0xe7   :  { %v109_v14 = vadd.f32 %v130_v12, %v100_v13 }
  0xe8   :  { %v101_v15 = vld [vmem:[#allocation2 + $0x8] sm:$0xff] }
  0xe9   :  { %v133_v16 = vpack.c.bf16 %v109_v14, %v109_v14  ;;  %v110_v17 = vadd.f32 %v130_v12, %v101_v15 }
  0xeb   :  { %120 = vst.msk [vmem:[%s198_s3] sm:$0xf] %vm119_vm3, %v133_v16  ;;  %v134_v18 = vpack.c.bf16 %v110_v17, %v110_v17 }
  0xed   :  { %121 = vst.msk [vmem:[%s198_s3 + $0x4] sm:$0xf] %vm119_vm3, %v134_v18 }

// kernel: bert_pooled_output.15
= control target key start
LH: loop header
LB: loop body
LE: loop exit
PB: predicated region body
PF: predicated region fallthrough
CT: control target
= control target key end

     0   :  { %vm28_vm0 = vcmask 261120   ;;  %v220_v0 = vmov 0.0   ;;  %vm221_vm1 = vmmov 0   ;;  %vm178_vm2 = vcmask 257024   ;;  %s293_s1 = inlined_call_operand.vmem [shape: bf16[32,32], index: 1, kind: input, shape index: {}]   ;;  %s294_s0 = inlined_call_operand.vmem [shape: bf16[16,32], index: 0, kind: input, shape index: {}]   ;;  %s295_s3 = inlined_call_operand.vmem [shape: bf16[16,32], index: 3, kind: input, shape index: {}]   ;;  %s296_s2 = inlined_call_operand.vmem [shape: f32[1,32], index: 2, kind: input, shape index: {}]   ;;  %s297_s4 = inlined_call_operand.vmem [shape: f32[1,32], index: 4, kind: input, shape index: {}]   ;;  %s298_s5 = inlined_call_operand.vmem [shape: f32[1,32], index: 5, kind: input, shape index: {}]   ;;  %s299_s6 = inlined_call_operand.vmem [shape: bf16[16,32], index: 6, kind: output, shape index: {}]  }
   0x1   :  { %203 = vmatprep.subr.bf16.mxu0 %v220_v0  ;;  %v213_v1 = vld [vmem:[%s293_s1] sm:$0xff]   ;;  %207 = vmatprep.mubr.msk.bf16.mxu0 %vm221_vm1, %v220_v0  ;;  %29 = vst.msk [vmem:[#allocation2] sm:$0xff] %vm28_vm0, %v220_v0  ;;  %30 = vst.msk [vmem:[#allocation2 + $0x8] sm:$0xff] %vm28_vm0, %v220_v0  ;;  %v214_v2 = vld [vmem:[%s293_s1 + $0x8] sm:$0xff]  }
   0x2   :  { %204 = vmatpush3.bf16.msra.mxu0 %v213_v1  ;;  %v215_v3 = vld [vmem:[%s294_s0] sm:$0xff]  }
   0x3   :  { %205 = vmatprep.subr.bf16.mxu0 %v220_v0  ;;  %v197_v12 = vld [vmem:[%s295_s3] sm:$0xff]  }
   0x4   :  { %v189_v13 = vld [vmem:[%s296_s2] ss:$0 sm:$0xff]  ;;  %v198_v14 = vunpack.c.l.bf16 %v197_v12  ;;  %v199_v17 = vunpack.c.h.bf16 %v197_v12 }
   0x5   :  { %v190_v41 = vld [vmem:[%s297_s4] ss:$0 sm:$0xff] }
   0x6   :  { %206 = vmatpush3.bf16.msra.mxu0 %v214_v2  ;;  %v191_v43 = vld [vmem:[%s298_s5] ss:$0 sm:$0xff] }
   0x8   :  { %v31_v4 = vld [vmem:[#allocation2] sm:$0xff]  ;;  %v32_v6 = vld [vmem:[#allocation2 + $0x8] sm:$0xff] }
   0x9   :  { %208 = vmatmul.mubr.msk.bf16.vlgmr.msra.gmra.mrb[0].mxu0 %vm28_vm0, %v215_v3 }
  0xdc   :  { %v94_v5 = vpop.f32.mrb[0].mxu0 }
  0xdd   :  { %v101_v7 = vadd.f32 %v94_v5, %v31_v4  ;;  %v209_v8 = vpop.f32.mrb[1].mxu0 }
  0xde   :  { %v97_v9 = vpop.f32.mrb[2].mxu0 }
  0xdf   :  { %103 = vst.msk [vmem:[#allocation2] sm:$0xff] %vm28_vm0, %v101_v7  ;;  %v102_v10 = vadd.f32 %v97_v9, %v32_v6  ;;  %v210_v11 = vpop.f32.mrb[3].mxu0 }
  0xe1   :  { %104 = vst.msk [vmem:[#allocation2 + $0x8] sm:$0xff] %vm28_vm0, %v102_v10 }
  0xe6   :  { %v108_v15 = vld [vmem:[#allocation2] sm:$0xff] }
  0xe7   :  { %v117_v16 = vadd.f32 %v189_v13, %v108_v15 }
  0xe8   :  { %v109_v18 = vld [vmem:[#allocation2 + $0x8] sm:$0xff] }
  0xe9   :  { %v123_v19 = vadd.f32 %v198_v14, %v117_v16  ;;  %v118_v20 = vadd.f32 %v189_v13, %v109_v18 }
  0xeb   :  { %v125_v21 = vsel %vm28_vm0, %v123_v19, 0.0  ;;  %v124_v22 = vadd.f32 %v199_v17, %v118_v20 }
  0xec   :  { %126 = vadd.xlane.f32.xlu0 %v125_v21 }
  0xed   :  { %v128_v23 = vsel %vm28_vm0, %v124_v22, 0.0 }
  0xf0   :  { %129 = vadd.xlane.f32.xlu0 %v128_v23 }
 0x179   :  { %v127_v24 = vpop.xlane.xlu0 %126 }
 0x17a   :  { %v132_v25 = vmul.f32 0.03125, %v127_v24 }
 0x17c   :  { %v134_v26 = vsub.f32 %v123_v19, %v132_v25 }
 0x17d   :  { %v130_v27 = vpop.xlane.xlu0 %129 }
 0x17e   :  { %v133_v28 = vmul.f32 0.03125, %v130_v27  ;;  %v136_v29 = vmul.f32 %v134_v26, %v134_v26 }
 0x180   :  { %v135_v30 = vsub.f32 %v124_v22, %v133_v28  ;;  %v138_v31 = vsel %vm28_vm0, %v136_v29, 0.0 }
 0x181   :  { %139 = vadd.xlane.f32.xlu1 %v138_v31 }
 0x182   :  { %v137_v32 = vmul.f32 %v135_v30, %v135_v30 }
 0x184   :  { %v141_v33 = vsel %vm28_vm0, %v137_v32, 0.0 }
 0x185   :  { %142 = vadd.xlane.f32.xlu1 %v141_v33 }
 0x20e   :  { %v140_v34 = vpop.xlane.xlu1 %139 }
 0x20f   :  { %v144_v35 = vmul.f32 0.03125, %v140_v34 }
 0x211   :  { %v146_v36 = vadd.f32 1e-12, %v144_v35 }
 0x212   :  { %v143_v37 = vpop.xlane.xlu1 %142 }
 0x213   :  { %216 = vrsqrt.f32 %v146_v36  ;;  %v145_v38 = vmul.f32 0.03125, %v143_v37 }
 0x215   :  { %v147_v39 = vadd.f32 1e-12, %v145_v38 }
 0x217   :  { %218 = vrsqrt.f32 %v147_v39 }
 0x21d   :  { %v217_v40 = vpop.eup %216 }
 0x21e   :  { %v150_v42 = vmul.f32 %v217_v40, %v134_v26 }
 0x220   :  { %v159_v44 = vmul.f32 %v190_v41, %v150_v42 }
 0x221   :  { %v219_v45 = vpop.eup %218 }
 0x222   :  { %v168_v46 = vadd.f32 %v191_v43, %v159_v44  ;;  %v151_v47 = vmul.f32 %v219_v45, %v135_v30 }
 0x224   :  { %v194_v48 = vpack.c.bf16 %v168_v46, %v168_v46  ;;  %v160_v49 = vmul.f32 %v190_v41, %v151_v47 }
 0x226   :  { %179 = vst.msk [vmem:[%s299_s6] sm:$0xf] %vm178_vm2, %v194_v48  ;;  %v169_v50 = vadd.f32 %v191_v43, %v160_v49 }
 0x228   :  { %v195_v51 = vpack.c.bf16 %v169_v50, %v169_v50 }
 0x22a   :  { %180 = vst.msk [vmem:[%s299_s6 + $0x4] sm:$0xf] %vm178_vm2, %v195_v51 }

// kernel: bert_pooled_output.14
= control target key start
LH: loop header
LB: loop body
LE: loop exit
PB: predicated region body
PF: predicated region fallthrough
CT: control target
= control target key end

     0   :  { %s974_s15 = smov 0   ;;  %s1078_s0 = inlined_call_operand.vmem [shape: bf16[2,8,32], index: 0, kind: input, shape index: {}]   ;;  %s1079_s1 = inlined_call_operand.vmem [shape: bf16[2,8,32], index: 1, kind: input, shape index: {}]   ;;  %s1080_s2 = inlined_call_operand.vmem [shape: bf16[2,8,32], index: 2, kind: input, shape index: {}]   ;;  %s1081_s3 = inlined_call_operand.vmem [shape: f32[2,1,8], index: 3, kind: input, shape index: {}]   ;;  %s1082_s4 = inlined_call_operand.vmem [shape: bf16[2,8,32], index: 4, kind: output, shape index: {}]  }
   0x1 LB: > { %s811_s16 = sadd.s32 4294967295, %s939_s15   ;;  %p815_p0 = scmp.ge.s32.totalorder %s939_s15, 1  ;;  %s939_s15 = sphi %s974_s15, %s14_s15  }
   0x2   : > { %p187_p1 = scmp.lt.s32.totalorder %s939_s15, 3 }
   0x4   : > { %p188_p2 = pnand %p815_p0, %p187_p1 }
   0x5   : > { %p222_p3 = scmp.lt.s32.totalorder (!%p188_p2), %s811_s16, 1  ;;  %v941_v0 = vmov (!%p188_p2), 0.0   ;;  %vm942_vm0 = vmmov (!%p188_p2), 0   ;;  %vm246_vm1 = vcmask (!%p188_p2), 64512   ;;  %s943_s27 = smov (!%p188_p2), 120   ;;  %vm316_vm2 = vcmask (!%p188_p2), 1043456  }
   0x6   : > { %191 = sbr.rel (%p188_p2) target bundleno = 1481 (0x5c9), region = 36  ;;  %850 = vmatprep.subr.bf16.mxu0 (!%p188_p2), %v941_v0  ;;  %852 = vmatprep.mubr.msk.bf16.mxu0 (!%p188_p2), %vm942_vm0, %v941_v0  ;;  %s944_s28 = smov (!%p188_p2), 112   ;;  %vm718_vm3 = vcmask (!%p188_p2), 130048   ;;  %vm720_vm4 = vcmask (!%p188_p2), 195584   ;;  %vm723_vm5 = vcmask (!%p188_p2), 257024  }
   0x7   : > { %856 = vmatprep.subr.bf16.mxu1 (!%p188_p2), %v941_v0  ;;  %858 = vmatprep.mubr.msk.bf16.mxu1 (!%p188_p2), %vm942_vm0, %v941_v0  ;;  %s945_s29 = smov (!%p188_p2), 104   ;;  %s946_s7 = smov (!%p188_p2), 8  }
   0x8   : > { %s947_s8 = smov (!%p188_p2), 16   ;;  %s948_s9 = smov (!%p188_p2), 24  }
   0xd   : > { %s1084_s16 = smov (!%p222_p3, %s811_s16), 1 }
   0xe   : > { %s988_s17 = sshll.u32 %s1084_s16, 2  ;;  %s236_s26 = scalar_lea.vmem %s1081_s3, %s1084_s16 }
   0xf   : > { %s229_s20 = scalar_lea.vmem %s1079_s1, %s988_s17  ;;  %s225_s23 = scalar_lea.vmem %s1078_s0, %s988_s17  ;;  %v1006_v5 = vld [vmem:[%s236_s26] ss:$0 sm:$0xff] }
  0x10   : > { %v243_v1 = vld [vmem:[%s229_s20] sm:$0xf]  ;;  %s233_s6 = scalar_lea.vmem %s1080_s2, %s988_s17  ;;  %s240_s12 = scalar_lea.vmem %s1082_s4, %s988_s17 }
  0x11   : > { %v251_v2 = vsel %vm246_vm1, %v243_v1, 0  ;;  %v242_v3 = vld [vmem:[%s225_s23] sm:$0xf]  ;;  %v824_v12 = vcombine.low %v243_v1, %v243_v1 }
  0x12   : > { %851 = vmatpush3.bf16.xpose.msra.mxu0 %v251_v2  ;;  %v823_v13 = vcombine.low %v242_v3, %v242_v3  ;;  %v1020_v19 = vld [vmem:[%s233_s6] sm:$0xf] }
  0x13   : > { %868 = vmatprep.subr.bf16.mxu0 %v941_v0  ;;  %368 = vrot.lane.b32.xlu1 %v824_v12, %s943_s27  ;;  %v318_v20 = vsel %vm316_vm2, %v1020_v19, 0 }
  0x14   : > { %857 = vmatpush3.bf16.msra.mxu1 %v318_v20 }
  0x15   : > { %862 = vmatprep.subr.bf16.mxu1 %v941_v0 }
  0x17   : > { %363 = vrot.lane.b32.xlu1 %v823_v13, %s943_s27 }
  0x19   : > { %853 = vmatmul.mubr.msk.bf16.vlgmr.msra.gmra.mrb[0].mxu0 %vm246_vm1, %v242_v3 }
  0x1a   : > { %870 = vmatprep.mubr.msk.bf16.mxu0 %vm942_vm0, %v941_v0 }
  0x1b   : > { %481 = vrot.lane.b32.xlu1 %v823_v13, %s944_s28 }
  0x1f   : > { %595 = vrot.lane.b32.xlu1 %v824_v12, %s945_s29 }
  0x23   : > { %593 = vrot.lane.b32.xlu1 %v823_v13, %s945_s29 }
  0x85   : > { %v369_v23 = vpop.permute.xlu1 %368 }
  0x86   : > { %v374_v25 = vsel %vm246_vm1, %v369_v23, 0 }
  0x89   : > { %v364_v27 = vpop.permute.xlu1 %363 }
  0x8d   : > { %v482_v29 = vpop.permute.xlu1 %481 }
  0x91   : > { %v596_v31 = vpop.permute.xlu1 %595 }
  0x92   : > { %v601_v32 = vsel %vm246_vm1, %v596_v31, 0 }
  0x95   : > { %v594_v33 = vpop.permute.xlu1 %593 }
  0xec   : > { %v287_v4 = vpop.f32.mrb[0].mxu0 }
  0xed   : > { %v293_v6 = vmul.f32 0.35355338, %v287_v4  ;;  %v854_v7 = vpop.f32.mrb[1].mxu0 }
  0xee   : > { %v290_v8 = vpop.f32.mrb[2].mxu0 }
  0xef   : > { %v855_v9 = vpop.f32.mrb[3].mxu0  ;;  %v300_v10 = vadd.f32 %v1006_v5, %v293_v6 }
  0xf1   : > { %v301_v11 = vsel %vm246_vm1, %v300_v10, -inf }
  0xf2   : > { %302 = vmax.xlane.f32.xlu0 %v301_v11 }
 0x17f   : > { %v303_v14 = vpop.xlane.xlu0 %302 }
 0x180   : > { %v304_v15 = vsub.f32 %v300_v10, %v303_v14 }
 0x182   : > { %v305_v16 = vmul.f32 1.442695, %v304_v15 }
 0x184   : > { %917 = vpow2.f32 %v305_v16 }
 0x18e   : > { %v918_v17 = vpop.eup %917 }
 0x18f   : > { %v307_v18 = vsel %vm246_vm1, %v918_v17, 0.0 }
 0x190   : > { %308 = vadd.xlane.f32.xlu0 %v307_v18 }
 0x1a6   : > { %483 = vrot.lane.b32.xlu0 %v824_v12, %s944_s28 }
 0x21d   : > { %v309_v21 = vpop.xlane.xlu0 %308 }
 0x21e   : > { %919 = vrcp.f32 %v309_v21 }
 0x221   : > { %v484_v28 = vpop.permute.xlu0 %483 }
 0x222   : > { %v489_v30 = vsel %vm246_vm1, %v484_v28, 0 }
 0x228   : > { %v920_v22 = vpop.eup %919 }
 0x229   : > { %v311_v24 = vmul.f32 %v920_v22, %v918_v17 }
 0x22b   : > { %v312_v26 = vpack.c.bf16 %v311_v24, %v311_v24 }
 0x22d   : > { %859 = vmatmul.mubr.msk.bf16.vlgmr.msra.gmra.mrb[0].mxu1 %vm246_vm1, %v312_v26 }
 0x22e   : > { %863 = vmatpush3.bf16.xpose.msra.mxu1 %v374_v25  ;;  %864 = vmatprep.mubr.msk.bf16.mxu1 %vm942_vm0, %v941_v0 }
 0x22f   : > { %874 = vmatprep.subr.bf16.mxu1 %v941_v0 }
 0x235   : > { %865 = vmatmul.mubr.msk.bf16.vlgmr.msra.gmra.mrb[4].mxu1 %vm246_vm1, %v364_v27 }
 0x236   : > { %875 = vmatpush3.bf16.xpose.msra.mxu1 %v489_v30  ;;  %876 = vmatprep.mubr.msk.bf16.mxu1 %vm942_vm0, %v941_v0 }
 0x237   : > { %886 = vmatprep.subr.bf16.mxu1 %v941_v0 }
 0x23d   : > { %877 = vmatmul.mubr.msk.bf16.vlgmr.msra.gmra.mrb[8].mxu1 %vm246_vm1, %v482_v29 }
 0x23e   : > { %887 = vmatpush3.bf16.xpose.msra.mxu1 %v601_v32  ;;  %888 = vmatprep.mubr.msk.bf16.mxu1 %vm942_vm0, %v941_v0 }
 0x245   : > { %889 = vmatmul.mubr.msk.bf16.vlgmr.msra.gmra.mrb[12].mxu1 %vm246_vm1, %v594_v33 }
 0x300   : > { %v1041_v34 = vpop.f32.mrb[0].mxu1 }
 0x301   : > { %v860_v35 = vpop.f32.mrb[1].mxu1 }
 0x302   : > { %v357_v36 = vpop.f32.mrb[2].mxu1 }
 0x303   : > { %v861_v37 = vpop.f32.mrb[3].mxu1 }
 0x308   : > { %v410_v38 = vpop.f32.mrb[4].mxu1 }
 0x309   : > { %v416_v39 = vmul.f32 0.35355338, %v410_v38  ;;  %v866_v40 = vpop.f32.mrb[5].mxu1 }
 0x30a   : > { %v413_v41 = vpop.f32.mrb[6].mxu1 }
 0x30b   : > { %v867_v42 = vpop.f32.mrb[7].mxu1  ;;  %v417_v43 = vadd.f32 %v1006_v5, %v416_v39 }
 0x30d   : > { %v418_v44 = vsel %vm246_vm1, %v417_v43, -inf }
 0x30e   : > { %419 = vmax.xlane.f32.xlu1 %v418_v44 }
 0x310   : > { %v525_v45 = vpop.f32.mrb[8].mxu1 }
 0x311   : > { %v531_v46 = vmul.f32 0.35355338, %v525_v45  ;;  %v878_v47 = vpop.f32.mrb[9].mxu1 }
 0x312   : > { %v528_v48 = vpop.f32.mrb[10].mxu1 }
 0x313   : > { %v532_v49 = vadd.f32 %v1006_v5, %v531_v46  ;;  %v879_v50 = vpop.f32.mrb[11].mxu1 }
 0x315   : > { %v533_v51 = vsel %vm246_vm1, %v532_v49, -inf }
 0x316   : > { %534 = vmax.xlane.f32.xlu0 %v533_v51 }
 0x318   : > { %v637_v52 = vpop.f32.mrb[12].mxu1 }
 0x319   : > { %v643_v53 = vmul.f32 0.35355338, %v637_v52  ;;  %v890_v54 = vpop.f32.mrb[13].mxu1 }
 0x31a   : > { %v640_v55 = vpop.f32.mrb[14].mxu1 }
 0x31b   : > { %v644_v56 = vadd.f32 %v1006_v5, %v643_v53  ;;  %v891_v57 = vpop.f32.mrb[15].mxu1  ;;  %v826_v5 = vcombine.low %v1020_v19, %v1020_v19 }
 0x31d   : > { %v645_v58 = vsel %vm246_vm1, %v644_v56, -inf }
 0x31e   : > { %646 = vmax.xlane.f32.xlu1 %v645_v58 }
 0x39b   : > { %v420_v59 = vpop.xlane.xlu1 %419 }
 0x39c   : > { %v421_v60 = vsub.f32 %v417_v43, %v420_v59 }
 0x39e   : > { %v422_v61 = vmul.f32 1.442695, %v421_v60 }
 0x3a0   : > { %921 = vpow2.f32 %v422_v61 }
 0x3a3   : > { %v535_v62 = vpop.xlane.xlu0 %534 }
 0x3a4   : > { %v536_v63 = vsub.f32 %v532_v49, %v535_v62 }
 0x3a6   : > { %v537_v1 = vmul.f32 1.442695, %v536_v63 }
 0x3a8   : > { %923 = vpow2.f32 %v537_v1 }
 0x3aa   : > { %v922_v2 = vpop.eup %921 }
 0x3ab   : > { %v424_v3 = vsel %vm246_vm1, %v922_v2, 0.0  ;;  %v647_v7 = vpop.xlane.xlu1 %646 }
 0x3ac   : > { %425 = vadd.xlane.f32.xlu1 %v424_v3  ;;  %v648_v8 = vsub.f32 %v644_v56, %v647_v7 }
 0x3ae   : > { %v649_v9 = vmul.f32 1.442695, %v648_v8 }
 0x3b0   : > { %925 = vpow2.f32 %v649_v9 }
 0x3b2   : > { %v924_v4 = vpop.eup %923 }
 0x3b3   : > { %v539_v6 = vsel %vm246_vm1, %v924_v4, 0.0 }
 0x3b4   : > { %540 = vadd.xlane.f32.xlu0 %v539_v6 }
 0x3ba   : > { %v926_v10 = vpop.eup %925 }
 0x3bb   : > { %v651_v11 = vsel %vm246_vm1, %v926_v10, 0.0 }
 0x3bd   : > { %545 = vrot.lane.b32.xlu1 %v826_v5, %s944_s28 }
 0x3ca   : > { %433 = vrot.lane.b32.xlu0 %v826_v5, %s943_s27 }
 0x3e1   : > { %652 = vadd.xlane.f32.xlu1 %v651_v11 }
 0x3f2   : > { %657 = vrot.lane.b32.xlu1 %v826_v5, %s945_s29 }
 0x439   : > { %v426_v12 = vpop.xlane.xlu1 %425 }
 0x43a   : > { %927 = vrcp.f32 %v426_v12 }
 0x43d   : > { %v546_v18 = vpop.permute.xlu1 %545 }
 0x43e   : > { %v551_v20 = vsel %vm316_vm2, %v546_v18, 0 }
 0x441   : > { %v541_v13 = vpop.xlane.xlu0 %540 }
 0x442   : > { %929 = vrcp.f32 %v541_v13 }
 0x444   : > { %v928_v14 = vpop.eup %927 }
 0x445   : > { %v428_v15 = vmul.f32 %v928_v14, %v922_v2  ;;  %v434_v16 = vpop.permute.xlu0 %433 }
 0x446   : > { %v439_v17 = vsel %vm316_vm2, %v434_v16, 0 }
 0x447   : > { %869 = vmatpush3.bf16.msra.mxu0 %v439_v17  ;;  %v429_v19 = vpack.c.bf16 %v428_v15, %v428_v15 }
 0x448   : > { %880 = vmatprep.subr.bf16.mxu0 %v941_v0 }
 0x44a   : > { %871 = vmatmul.mubr.msk.bf16.vlgmr.msra.gmra.mrb[4].mxu0 %vm246_vm1, %v429_v19 }
 0x44b   : > { %881 = vmatpush3.bf16.msra.mxu0 %v551_v20  ;;  %882 = vmatprep.mubr.msk.bf16.mxu0 %vm942_vm0, %v941_v0 }
 0x44c   : > { %v930_v21 = vpop.eup %929  ;;  %892 = vmatprep.subr.bf16.mxu0 %v941_v0 }
 0x44d   : > { %v543_v22 = vmul.f32 %v930_v21, %v924_v4 }
 0x44f   : > { %v544_v23 = vpack.c.bf16 %v543_v22, %v543_v22 }
 0x452   : > { %883 = vmatmul.mubr.msk.bf16.vlgmr.msra.gmra.mrb[8].mxu0 %vm246_vm1, %v544_v23 }
 0x453   : > { %894 = vmatprep.mubr.msk.bf16.mxu0 %vm942_vm0, %v941_v0 }
 0x46e   : > { %v653_v24 = vpop.xlane.xlu1 %652 }
 0x46f   : > { %931 = vrcp.f32 %v653_v24 }
 0x472   : > { %v658_v25 = vpop.permute.xlu1 %657 }
 0x473   : > { %v663_v26 = vsel %vm316_vm2, %v658_v25, 0 }
 0x474   : > { %893 = vmatpush3.bf16.msra.mxu0 %v663_v26 }
 0x479   : > { %v932_v27 = vpop.eup %931 }
 0x47a   : > { %v655_v28 = vmul.f32 %v932_v27, %v926_v10 }
 0x47c   : > { %v656_v29 = vpack.c.bf16 %v655_v28, %v655_v28 }
 0x47e   : > { %895 = vmatmul.mubr.msk.bf16.vlgmr.msra.gmra.mrb[12].mxu0 %vm246_vm1, %v656_v29 }
 0x51d   : > { %v475_v30 = vpop.f32.mrb[4].mxu0 }
 0x51e   : > { %706 = vrot.lane.b32.xlu0 %v475_v30, %s946_s7  ;;  %v872_v31 = vpop.f32.mrb[5].mxu0 }
 0x51f   : > { %v478_v32 = vpop.f32.mrb[6].mxu0 }
 0x520   : > { %v873_v33 = vpop.f32.mrb[7].mxu0 }
 0x525   : > { %v587_v35 = vpop.f32.mrb[8].mxu0 }
 0x526   : > { %710 = vrot.lane.b32.xlu1 %v587_v35, %s947_s8  ;;  %v884_v0 = vpop.f32.mrb[9].mxu0 }
 0x527   : > { %v590_v36 = vpop.f32.mrb[10].mxu0 }
 0x528   : > { %v885_v37 = vpop.f32.mrb[11].mxu0 }
 0x551   : > { %v699_v38 = vpop.f32.mrb[12].mxu0 }
 0x552   : > { %714 = vrot.lane.b32.xlu0 %v699_v38, %s948_s9  ;;  %v896_v39 = vpop.f32.mrb[13].mxu0 }
 0x553   : > { %v702_v40 = vpop.f32.mrb[14].mxu0 }
 0x554   : > { %v897_v41 = vpop.f32.mrb[15].mxu0 }
 0x590   : > { %v707_v42 = vpop.permute.xlu0 %706 }
 0x591   : > { %v717_v44 = vsel %vm246_vm1, %v1041_v34, %v707_v42 }
 0x598   : > { %v711_v43 = vpop.permute.xlu1 %710 }
 0x599   : > { %v719_v45 = vsel %vm718_vm3, %v717_v44, %v711_v43 }
 0x5c4   : > { %v715_v46 = vpop.permute.xlu0 %714 }
 0x5c5   : > { %v721_v47 = vsel %vm720_vm4, %v719_v45, %v715_v46 }
 0x5c6   : > { %v722_v48 = vpack.c.bf16 %v721_v47, %v721_v47 }
 0x5c8   : > { %724 = vst.msk [vmem:[%s240_s12] sm:$0xf] %vm723_vm5, %v722_v48 }
 0x5c9 PF: > { %s14_s15 = sadd.s32 1, %s939_s15  }
 0x5ca   : > { %p11_p4 = scmp.ge.s32.totalorder %s14_s15, 4  }
 0x5cc   :  { %13 = sbr.rel (!%p11_p4) target bundleno = 1 (0x1), region = 75 }

// kernel: bert_pooled_output.16
= control target key start
LH: loop header
LB: loop body
LE: loop exit
PB: predicated region body
PF: predicated region fallthrough
CT: control target
= control target key end

     0   :  { %vm19_vm0 = vcmask 523264   ;;  %v173_v0 = vmov 0.0   ;;  %vm174_vm1 = vmmov 0   ;;  %vm47_vm2 = vcmask 261120   ;;  %s217_s1 = inlined_call_operand.vmem [shape: bf16[32,64], index: 1, kind: input, shape index: {}]   ;;  %s218_s0 = inlined_call_operand.vmem [shape: bf16[16,32], index: 0, kind: input, shape index: {}]   ;;  %s219_s2 = inlined_call_operand.vmem [shape: f32[1,64], index: 2, kind: input, shape index: {}]   ;;  %s220_s3 = inlined_call_operand.vmem [shape: bf16[16,64], index: 3, kind: output, shape index: {}]  }
   0x1   :  { %156 = vmatprep.subr.bf16.mxu0 %v173_v0  ;;  %v166_v1 = vld [vmem:[%s217_s1] sm:$0xff]   ;;  %160 = vmatprep.mubr.msk.bf16.mxu0 %vm174_vm1, %v173_v0  ;;  %20 = vst.msk [vmem:[#allocation2] sm:$0xff] %vm19_vm0, %v173_v0  ;;  %21 = vst.msk [vmem:[#allocation2 + $0x8] sm:$0xff] %vm19_vm0, %v173_v0  ;;  %v167_v2 = vld [vmem:[%s217_s1 + $0x8] sm:$0xff]   ;;  %vm137_vm3 = vcmask 519168  }
   0x2   :  { %157 = vmatpush3.bf16.msra.mxu0 %v166_v1  ;;  %v168_v3 = vld [vmem:[%s218_s0] sm:$0xff]  }
   0x3   :  { %158 = vmatprep.subr.bf16.mxu0 %v173_v0  ;;  %v148_v12 = vld [vmem:[%s219_s2] ss:$0 sm:$0xff] }
   0x6   :  { %159 = vmatpush3.bf16.msra.mxu0 %v167_v2 }
   0x8   :  { %v22_v4 = vld [vmem:[#allocation2] sm:$0xff]  ;;  %v23_v6 = vld [vmem:[#allocation2 + $0x8] sm:$0xff] }
   0x9   :  { %161 = vmatmul.mubr.msk.bf16.vlgmr.msra.gmra.mrb[0].mxu0 %vm47_vm2, %v168_v3 }
  0xdc   :  { %v85_v5 = vpop.f32.mrb[0].mxu0 }
  0xdd   :  { %v92_v7 = vadd.f32 %v85_v5, %v22_v4  ;;  %v162_v8 = vpop.f32.mrb[1].mxu0 }
  0xde   :  { %v88_v9 = vpop.f32.mrb[2].mxu0 }
  0xdf   :  { %95 = vst.msk [vmem:[#allocation2] sm:$0xff] %vm19_vm0, %v92_v7  ;;  %v93_v10 = vadd.f32 %v88_v9, %v23_v6  ;;  %v163_v11 = vpop.f32.mrb[3].mxu0 }
  0xe1   :  { %96 = vst.msk [vmem:[#allocation2 + $0x8] sm:$0xff] %vm19_vm0, %v93_v10 }
  0xe6   :  { %v100_v13 = vld [vmem:[#allocation2] sm:$0xff] }
  0xe7   :  { %v109_v14 = vadd.f32 %v148_v12, %v100_v13 }
  0xe8   :  { %v101_v15 = vld [vmem:[#allocation2 + $0x8] sm:$0xff] }
  0xe9   :  { %v113_v16 = vmul.f32 0.044715, %v109_v14  ;;  %v110_v17 = vadd.f32 %v148_v12, %v101_v15  ;;  %v111_v28 = vmul.f32 0.5, %v109_v14 }
  0xeb   :  { %v115_v18 = vmul.f32 %v113_v16, %v109_v14  ;;  %v114_v19 = vmul.f32 0.044715, %v110_v17  ;;  %v112_v32 = vmul.f32 0.5, %v110_v17 }
  0xed   :  { %v117_v20 = vmul.f32 %v115_v18, %v109_v14  ;;  %v116_v21 = vmul.f32 %v114_v19, %v110_v17 }
  0xef   :  { %v119_v22 = vadd.f32 %v117_v20, %v109_v14  ;;  %v118_v23 = vmul.f32 %v116_v21, %v110_v17 }
  0xf1   :  { %v121_v24 = vmul.f32 0.7978846, %v119_v22  ;;  %v120_v25 = vadd.f32 %v118_v23, %v110_v17 }
  0xf3   :  { %169 = vtanh.f32 %v121_v24  ;;  %v122_v26 = vmul.f32 0.7978846, %v120_v25 }
  0xf5   :  { %171 = vtanh.f32 %v122_v26 }
  0xfd   :  { %v170_v27 = vpop.eup %169 }
  0xfe   :  { %v125_v29 = vadd.f32 1.0, %v170_v27 }
  0xff   :  { %v172_v30 = vpop.eup %171 }
 0x100   :  { %v127_v31 = vmul.f32 %v125_v29, %v111_v28  ;;  %v126_v33 = vadd.f32 1.0, %v172_v30 }
 0x102   :  { %v151_v34 = vpack.c.bf16 %v127_v31, %v127_v31  ;;  %v128_v35 = vmul.f32 %v126_v33, %v112_v32 }
 0x104   :  { %138 = vst.msk [vmem:[%s220_s3] sm:$0xf] %vm137_vm3, %v151_v34  ;;  %v152_v36 = vpack.c.bf16 %v128_v35, %v128_v35 }
 0x106   :  { %139 = vst.msk [vmem:[%s220_s3 + $0x4] sm:$0xf] %vm137_vm3, %v152_v36 }

// kernel: bert_pooled_output.17
= control target key start
LH: loop header
LB: loop body
LE: loop exit
PB: predicated region body
PF: predicated region fallthrough
CT: control target
= control target key end

     0   :  { %vm28_vm0 = vcmask 261120   ;;  %v247_v0 = vmov 0.0   ;;  %vm248_vm1 = vmmov 0   ;;  %vm72_vm2 = vcmask 523264   ;;  %s325_s1 = inlined_call_operand.vmem [shape: bf16[64,32], index: 1, kind: input, shape index: {}]   ;;  %s326_s0 = inlined_call_operand.vmem [shape: bf16[16,64], index: 0, kind: input, shape index: {}]   ;;  %s327_s3 = inlined_call_operand.vmem [shape: bf16[16,32], index: 3, kind: input, shape index: {}]   ;;  %s328_s2 = inlined_call_operand.vmem [shape: f32[1,32], index: 2, kind: input, shape index: {}]   ;;  %s329_s4 = inlined_call_operand.vmem [shape: f32[1,32], index: 4, kind: input, shape index: {}]   ;;  %s330_s5 = inlined_call_operand.vmem [shape: f32[1,32], index: 5, kind: input, shape index: {}]   ;;  %s331_s6 = inlined_call_operand.vmem [shape: bf16[16,32], index: 6, kind: output, shape index: {}]  }
   0x1   :  { %224 = vmatprep.subr.bf16.mxu0 %v247_v0  ;;  %v238_v1 = vld [vmem:[%s325_s1] sm:$0xff]   ;;  %232 = vmatprep.mubr.msk.bf16.mxu0 %vm248_vm1, %v247_v0  ;;  %29 = vst.msk [vmem:[#allocation2] sm:$0xff] %vm28_vm0, %v247_v0  ;;  %30 = vst.msk [vmem:[#allocation2 + $0x8] sm:$0xff] %vm28_vm0, %v247_v0  ;;  %v239_v2 = vld [vmem:[%s325_s1 + $0x8] sm:$0xff]   ;;  %vm195_vm3 = vcmask 257024  }
   0x2   :  { %225 = vmatpush3.bf16.msra.mxu0 %v238_v1  ;;  %v240_v3 = vld [vmem:[%s325_s1 + $0x10] sm:$0xff]   ;;  %v241_v4 = vld [vmem:[%s325_s1 + $0x18] sm:$0xff]   ;;  %v242_v5 = vld [vmem:[%s326_s0] sm:$0xff]  }
   0x3   :  { %226 = vmatprep.subr.bf16.mxu0 %v247_v0  ;;  %v216_v14 = vld [vmem:[%s327_s3] sm:$0xff]  }
   0x4   :  { %v208_v15 = vld [vmem:[%s328_s2] ss:$0 sm:$0xff]  ;;  %v217_v16 = vunpack.c.l.bf16 %v216_v14  ;;  %v218_v19 = vunpack.c.h.bf16 %v216_v14 }
   0x5   :  { %v209_v43 = vld [vmem:[%s329_s4] ss:$0 sm:$0xff] }
   0x6   :  { %227 = vmatpush3.bf16.msra.mxu0 %v239_v2  ;;  %v210_v45 = vld [vmem:[%s330_s5] ss:$0 sm:$0xff] }
   0x7   :  { %228 = vmatprep.subr.bf16.mxu0 %v247_v0 }
   0x8   :  { %v31_v6 = vld [vmem:[#allocation2] sm:$0xff]  ;;  %v32_v8 = vld [vmem:[#allocation2 + $0x8] sm:$0xff] }
   0xa   :  { %229 = vmatpush3.bf16.msra.mxu0 %v240_v3 }
   0xb   :  { %230 = vmatprep.subr.bf16.mxu0 %v247_v0 }
   0xe   :  { %231 = vmatpush3.bf16.msra.mxu0 %v241_v4 }
  0x11   :  { %233 = vmatmul.mubr.msk.bf16.vlgmr.msra.gmra.mrb[0].mxu0 %vm72_vm2, %v242_v5 }
  0xe4   :  { %v110_v7 = vpop.f32.mrb[0].mxu0 }
  0xe5   :  { %v117_v9 = vadd.f32 %v110_v7, %v31_v6  ;;  %v234_v10 = vpop.f32.mrb[1].mxu0 }
  0xe6   :  { %v113_v11 = vpop.f32.mrb[2].mxu0 }
  0xe7   :  { %120 = vst.msk [vmem:[#allocation2] sm:$0xff] %vm28_vm0, %v117_v9  ;;  %v118_v12 = vadd.f32 %v113_v11, %v32_v8  ;;  %v235_v13 = vpop.f32.mrb[3].mxu0 }
  0xe9   :  { %121 = vst.msk [vmem:[#allocation2 + $0x8] sm:$0xff] %vm28_vm0, %v118_v12 }
  0xee   :  { %v125_v17 = vld [vmem:[#allocation2] sm:$0xff] }
  0xef   :  { %v134_v18 = vadd.f32 %v208_v15, %v125_v17 }
  0xf0   :  { %v126_v20 = vld [vmem:[#allocation2 + $0x8] sm:$0xff] }
  0xf1   :  { %v140_v21 = vadd.f32 %v217_v16, %v134_v18  ;;  %v135_v22 = vadd.f32 %v208_v15, %v126_v20 }
  0xf3   :  { %v142_v23 = vsel %vm28_vm0, %v140_v21, 0.0  ;;  %v141_v24 = vadd.f32 %v218_v19, %v135_v22 }
  0xf4   :  { %143 = vadd.xlane.f32.xlu0 %v142_v23 }
  0xf5   :  { %v145_v25 = vsel %vm28_vm0, %v141_v24, 0.0 }
  0xf8   :  { %146 = vadd.xlane.f32.xlu0 %v145_v25 }
 0x181   :  { %v144_v26 = vpop.xlane.xlu0 %143 }
 0x182   :  { %v149_v27 = vmul.f32 0.03125, %v144_v26 }
 0x184   :  { %v151_v28 = vsub.f32 %v140_v21, %v149_v27 }
 0x185   :  { %v147_v29 = vpop.xlane.xlu0 %146 }
 0x186   :  { %v150_v30 = vmul.f32 0.03125, %v147_v29  ;;  %v153_v31 = vmul.f32 %v151_v28, %v151_v28 }
 0x188   :  { %v152_v32 = vsub.f32 %v141_v24, %v150_v30  ;;  %v155_v33 = vsel %vm28_vm0, %v153_v31, 0.0 }
 0x189   :  { %156 = vadd.xlane.f32.xlu1 %v155_v33 }
 0x18a   :  { %v154_v34 = vmul.f32 %v152_v32, %v152_v32 }
 0x18c   :  { %v158_v35 = vsel %vm28_vm0, %v154_v34, 0.0 }
 0x18d   :  { %159 = vadd.xlane.f32.xlu1 %v158_v35 }
 0x216   :  { %v157_v36 = vpop.xlane.xlu1 %156 }
 0x217   :  { %v161_v37 = vmul.f32 0.03125, %v157_v36 }
 0x219   :  { %v163_v38 = vadd.f32 1e-12, %v161_v37 }
 0x21a   :  { %v160_v39 = vpop.xlane.xlu1 %159 }
 0x21b   :  { %243 = vrsqrt.f32 %v163_v38  ;;  %v162_v40 = vmul.f32 0.03125, %v160_v39 }
 0x21d   :  { %v164_v41 = vadd.f32 1e-12, %v162_v40 }
 0x21f   :  { %245 = vrsqrt.f32 %v164_v41 }
 0x225   :  { %v244_v42 = vpop.eup %243 }
 0x226   :  { %v167_v44 = vmul.f32 %v244_v42, %v151_v28 }
 0x228   :  { %v176_v46 = vmul.f32 %v209_v43, %v167_v44 }
 0x229   :  { %v246_v47 = vpop.eup %245 }
 0x22a   :  { %v185_v48 = vadd.f32 %v210_v45, %v176_v46  ;;  %v168_v49 = vmul.f32 %v246_v47, %v152_v32 }
 0x22c   :  { %v213_v50 = vpack.c.bf16 %v185_v48, %v185_v48  ;;  %v177_v51 = vmul.f32 %v209_v43, %v168_v49 }
 0x22e   :  { %196 = vst.msk [vmem:[%s331_s6] sm:$0xf] %vm195_vm3, %v213_v50  ;;  %v186_v52 = vadd.f32 %v210_v45, %v177_v51 }
 0x230   :  { %v214_v53 = vpack.c.bf16 %v186_v52, %v186_v52 }
 0x232   :  { %197 = vst.msk [vmem:[%s331_s6 + $0x4] sm:$0xf] %vm195_vm3, %v214_v53 }

// kernel: bert_pooled_output.23
= control target key start
LH: loop header
LB: loop body
LE: loop exit
PB: predicated region body
PF: predicated region fallthrough
CT: control target
= control target key end

     0   :  { %v161_v1 = vmov 0.0   ;;  %vm162_vm0 = vmmov 0   ;;  %vm20_vm1 = vcmask 254976   ;;  %s211_s0 = inlined_call_operand.vmem [shape: bf16[2,32], index: 0, kind: input, shape index: {}]   ;;  %s212_s1 = inlined_call_operand.vmem [shape: bf16[32,32], index: 1, kind: input, shape index: {}]   ;;  %s213_s2 = inlined_call_operand.vmem [shape: f32[1,32], index: 2, kind: input, shape index: {}]   ;;  %s214_s3 = inlined_call_operand.hbm [shape: f32[2,32], index: 3, kind: output, shape index: {}]  }
   0x1   :  { %v133_v0 = vld [vmem:[%s212_s1] sm:$0xff]   ;;  %122 = vmatprep.subr.bf16.mxu0 %v161_v1  ;;  %v134_v2 = vld [vmem:[%s212_s1 + $0x8] sm:$0xff]   ;;  %126 = vmatprep.mubr.msk.bf16.mxu0 %vm162_vm0, %v161_v1 }
   0x2   :  { %123 = vmatpush3.bf16.msra.mxu0 %v133_v0 }
   0x3   :  { %8 = vsyncpa [#allocation4], 0  ;;  %124 = vmatprep.subr.bf16.mxu0 %v161_v1  ;;  %21 = vst.msk [vmem:[#allocation2] sm:$0x3] %vm20_vm1, %v161_v1  ;;  %v23_v3 = vld [vmem:[%s211_s0] sm:$0x1] }
   0x4   :  { %vm40_vm2 = vcmask 261120   ;;  %v118_v10 = vld [vmem:[%s213_s2] ss:$0 sm:$0xff]  ;;  %s163_s19 = smov [#allocation3]  }
   0x5   :  { %s107_s20 = sshll.u32 %s163_s19, 4  ;;  %s108_s20 = int_to_ptr.vmem [resolvable:$true] %s107_s20 }
   0x6   :  { %125 = vmatpush3.bf16.msra.mxu0 %v134_v2  ;;  %s137_s0 = scalar_lea.vmem %s108_s20, 32  ;;  %p142_p1 = scmp.lt.s32.totalorder %s108_s20, %s108_s20 }
   0x7   :  { %p138_p0 = scmp.ne.s32.totalorder %s108_s20, %s137_s0  ;;  %p143_p2 = scmp.lt.s32.totalorder %s137_s0, %s137_s0 }
   0x9   :  { %127 = vmatmul.mubr.msk.bf16.vlgmr.msra.gmra.mrb[0].mxu0 %vm40_vm2, %v23_v3  ;;  %p144_p3 = por %p143_p2, %p142_p1 }
   0xa   :  { %v22_v4 = vld [vmem:[#allocation2] sm:$0x3] }
   0xb   :  { %p145_p4 = pnand %p144_p3, %p138_p0 }
  0xdc   :  { %v78_v5 = vpop.f32.mrb[0].mxu0 }
  0xdd   :  { %v84_v6 = vadd.f32 %v78_v5, %v22_v4  ;;  %v128_v7 = vpop.f32.mrb[1].mxu0 }
  0xde   :  { %v81_v8 = vpop.f32.mrb[2].mxu0 }
  0xdf   :  { %86 = vst.msk [vmem:[#allocation2] sm:$0x3] %vm20_vm1, %v84_v6  ;;  %v129_v9 = vpop.f32.mrb[3].mxu0 }
  0xe6   :  { %v90_v11 = vld [vmem:[#allocation2] sm:$0x3] }
  0xe7   :  { %v98_v12 = vadd.f32 %v118_v10, %v90_v11 }
  0xe9   :  { %135 = vtanh.f32 %v98_v12 }
  0xf3   :  { %v136_v13 = vpop.eup %135 }
  0xf4   :  { %100 = vst.msk [vmem:[#allocation3] sm:$0x3] %vm20_vm1, %v136_v13 }
  0xf5   :  { %148 = shalt.err (!%p145_p4)
}
  0xf6   :  { %s149_s2 = scalar_lea.hbm %s214_s3, 32 }
  0xf7   :  { %p150_p5 = scmp.ne.s32.totalorder %s214_s3, %s149_s2  ;;  %p153_p6 = scmp.lt.u32.totalorder %s149_s2, %s214_s3 }
  0xf9   :  { %p155_p7 = pnand %p153_p6, %p150_p5 }
  0xfb   :  { %158 = shalt.err (!%p155_p7)
}
  0xfc   :  { %110 = dma.vmem_to_hbm [thread:$0]  %s108_s20, 32, %s214_s3, [#allocation4]  }
  0xfd   :  { %159 = dma.done.wait [#allocation4], 32  }
  0xfe   :  { %160 = vsyncadd [#allocation4], 4294967264 }
  0xff   :  { %114 = vsyncpa [#allocation4], 1 }

</bundles_post_ra>
